<compile_context>
chip_gen: v6e
topology: v6e:2x2x1
jax: 0.10.0
libtpu: 0.0.40
codegen_flags: <defaults>
</compile_context>

<pallas_src>
import jax
import jax.numpy as jnp
from jax.experimental import pallas as pl
from jax.experimental.pallas import tpu as pltpu


def upsample_kernel(x_ref, w_ref, b_ref, o_ref):
    # x_ref: (bN, tH+2, W+2, Cin)              halo'd NHWC input tile
    # w_ref: (2, Kp, 2*Cout)                   packed weights, one per row parity
    # b_ref: (1, 2*Cout)                       bias tiled over the column parity
    # o_ref: (bN, tH, 2*W*2*Cout)              lane-dense folded output tile,  or
    #        (bN, tH, 2, W, 2*Cout)            plain layout when 2*Cout % 128 == 0
    bN, hp2, wp2, cin = x_ref.shape
    tH, W = hp2 - 2, wp2 - 2
    kp = w_ref.shape[1]
    c2 = w_ref.shape[2]                        # 2*Cout (column parity folded in N)
    row = W * c2                               # lane width of one output-row parity

    # im2col: pack the 3x3 neighbourhood along channels (da-major K order) so each
    # output-row parity is ONE MXU matmul over all bN*tH*W pixels.
    taps = [x_ref[:, da:da + tH, db:db + W, :]
            for da in range(3) for db in range(3)]
    patches = jnp.concatenate(taps, axis=-1).reshape(bN * tH * W, 9 * cin)

    bias = b_ref[...]                          # (1, 2*Cout), hoisted once
    for ph in range(2):                        # output-row parity
        # Parity ph only touches da in {ph, ph+1}: if the wrapper trimmed the zero
        # K rows (kp == 6*Cin, Cin % 128 == 0) take the aligned K slice.
        lhs = patches if kp == 9 * cin else patches[:, ph * 3 * cin: ph * 3 * cin + kp]
        acc = jnp.dot(lhs, w_ref[ph], preferred_element_type=jnp.float32)
        acc = (acc + bias).astype(o_ref.dtype)
        if o_ref.ndim == 3:
            # Fold (j, pw, co) onto the lane axis (2*Cout < 128): per-column concat
            # keeps every op in the known-supported slice/concat family while the
            # resulting store is a full-width, 128-aligned lane slice.
            acc4 = acc.reshape(bN, tH, W, c2)          # leading-dim split only
            dense = jnp.concatenate([acc4[:, :, j, :] for j in range(W)], axis=-1)
            # o[b, i, ph*W*2C + j*2C + pw*Cout + co] == y_nhwc[b, 2i+ph, 2j+pw, co]
            o_ref[:, :, ph * row:(ph + 1) * row] = dense
        else:
            # 2*Cout is already a lane multiple of 128: plain store is dense.
            o_ref[:, :, ph:ph + 1, :, :] = acc.reshape(bN, tH, 1, W, c2)


def _pack_weights(weight, Cin, Cout, dtype):
    # Patch channel k = (da*3 + db)*Cin + ci holds x_pad[i+da, j+db, ci]; a tap
    # contributes to parity (ph, pw) iff da-ph in {0,1} and db-pw in {0,1}, with
    # kernel taps kh = 3+ph-2da, kw = 3+pw-2db.  Unused taps are zero rows.
    wt = jnp.transpose(weight, (2, 3, 0, 1))           # (kh, kw, Cin, Cout)
    w_pack = jnp.zeros((2, 3, 3, Cin, 2, Cout), dtype)
    for ph in range(2):
        for pw in range(2):
            for da in range(ph, ph + 2):
                for db in range(pw, pw + 2):
                    kh = 3 + ph - 2 * da
                    kw = 3 + pw - 2 * db
                    w_pack = w_pack.at[ph, da, db, :, pw, :].set(
                        wt[kh, kw].astype(dtype))
    w_pack = w_pack.reshape(2, 9 * Cin, 2 * Cout)
    if (3 * Cin) % 128 == 0:
        # Drop the 3*Cin all-zero K rows per parity (aligned slice only).
        w_pack = jnp.stack(
            [w_pack[ph, ph * 3 * Cin: ph * 3 * Cin + 6 * Cin] for ph in range(2)])
    return w_pack


def upsample(x_nchw, weight, bias, *, batch_block=1, h_block=None,
             compute_dtype=jnp.bfloat16):
    """ConvTranspose2d(kernel=4, stride=2, padding=1) forward.

    x_nchw: (N, Cin, H, W); weight: (Cin, Cout, 4, 4); bias: (Cout,)
    returns (N, Cout, 2H, 2W)
    """
    N, Cin, H, W = x_nchw.shape
    Cout = weight.shape[1]
    assert weight.shape == (Cin, Cout, 4, 4)
    assert N % batch_block == 0
    bN = batch_block
    out_dtype = x_nchw.dtype
    cdt = jnp.dtype(compute_dtype)

    # Per-generation VMEM budget (128 MiB physical on v5e/v6e, 64 MiB on v7x).
    try:
        vmem_cap = pltpu.get_tpu_info().vmem_capacity_bytes
    except Exception:
        vmem_cap = 128 * 1024 * 1024
    vmem_limit = min(int(vmem_cap * 0.8), 100 * 1024 * 1024)

    w_pack = _pack_weights(weight, Cin, Cout, cdt)      # (2, Kp, 2*Cout)
    kp = w_pack.shape[1]
    b_pack = jnp.tile(bias.astype(jnp.float32), 2).reshape(1, 2 * Cout)

    # ---- H tile: bound per-step VMEM, keep >=2 tiles (pipeline overlap + v7x
    # core parallelism), keep tH sublane-dense (multiple of 8).
    in_isz, out_isz = cdt.itemsize, jnp.dtype(out_dtype).itemsize
    w_bytes = 2 * w_pack.size * in_isz                  # two pipeline buffers

    def vmem_need(tH):
        in_blk = bN * (tH + 2) * (W + 2) * Cin * in_isz
        out_blk = bN * tH * 4 * W * Cout * out_isz
        patches = bN * tH * W * 9 * Cin * in_isz        # im2col intermediate
        acc = bN * tH * W * 2 * Cout * 4                # f32 accumulator
        return 2 * in_blk + 2 * out_blk + patches + 2 * acc + w_bytes

    if h_block is None:
        cands = [t for t in range(H, 0, -1)
                 if H % t == 0 and (t % 8 == 0 or t == H)]
        fit = [t for t in cands if vmem_need(t) <= vmem_limit // 2] or [cands[-1]]
        multi = [t for t in fit if H // t >= 2]
        h_block = multi[0] if multi else fit[0]
    assert H % h_block == 0
    tH, nH = h_block, H // h_block

    # ---- channels-last + 1px zero halo, then halo'd per-tile slabs so plain
    # Blocked BlockSpecs can pipeline them (no overlapping-window index maps).
    x_pad = jnp.pad(jnp.transpose(x_nchw, (0, 2, 3, 1)).astype(cdt),
                    ((0, 0), (1, 1), (1, 1), (0, 0)))   # (N, H+2, W+2, Cin)
    x_tiles = jnp.stack(
        [x_pad[:, t * tH: t * tH + tH + 2] for t in range(nH)],
        axis=0)                                         # (nH, N, tH+2, W+2, Cin)

    fold = (2 * Cout) % 128 != 0                        # fold j onto lanes if sparse
    lane = 2 * W * 2 * Cout
    if fold:
        out_shape = jax.ShapeDtypeStruct((N, H, lane), out_dtype)
        out_spec = pl.BlockSpec((bN, tH, lane), lambda n, h: (n, h, 0))
    else:
        out_shape = jax.ShapeDtypeStruct((N, H, 2, W, 2 * Cout), out_dtype)
        out_spec = pl.BlockSpec((bN, tH, 2, W, 2 * Cout),
                                lambda n, h: (n, h, 0, 0, 0))

    flops = 2 * 2 * (N * H * W) * kp * (2 * Cout)
    bytes_accessed = (x_tiles.size * in_isz + w_pack.size * in_isz
                      + b_pack.size * 4 + N * H * lane * out_isz)

    out = pl.pallas_call(
        upsample_kernel,
        out_shape=out_shape,
        grid_spec=pltpu.PrefetchScalarGridSpec(
            num_scalar_prefetch=0,
            grid=(N // bN, nH),
            in_specs=[
                pl.BlockSpec((None, bN, tH + 2, W + 2, Cin),
                             lambda n, h: (h, n, 0, 0, 0)),
                # constant index_maps -> weights / bias stay VMEM-resident.
                pl.BlockSpec((2, kp, 2 * Cout), lambda n, h: (0, 0, 0)),
                pl.BlockSpec((1, 2 * Cout), lambda n, h: (0, 0)),
            ],
            out_specs=out_spec,
        ),
        compiler_params=pltpu.CompilerParams(
            dimension_semantics=("parallel", "parallel"),
            vmem_limit_bytes=vmem_limit,
        ),
        cost_estimate=pl.CostEstimate(flops=int(flops), transcendentals=0,
                                      bytes_accessed=int(bytes_accessed)),
    )(x_tiles, w_pack, b_pack)

    # Kernel memory order is (n, i, ph, j, pw, co) == NHWC of y, so this reshape
    # is free; only the unavoidable NHWC->NCHW boundary transpose remains.
    y = out.reshape(N, 2 * H, 2 * W, Cout)
    return jnp.transpose(y, (0, 3, 1, 2))


def ref_conv_transpose(x, weight, bias):
    """Pure-JAX reference: ConvTranspose2d as a dilated conv with flipped kernel."""
    w_flip = weight[:, :, ::-1, ::-1]
    w_conv = jnp.transpose(w_flip, (1, 0, 2, 3))        # OIHW
    y = jax.lax.conv_general_dilated(
        x, w_conv,
        window_strides=(1, 1),
        padding=((2, 2), (2, 2)),
        lhs_dilation=(2, 2),
        dimension_numbers=("NCHW", "OIHW", "NCHW"),
        precision=jax.lax.Precision.HIGHEST,
    )
    return y + bias.reshape(1, -1, 1, 1)


if __name__ == "__main__":
    N, Cin, Cout, H, W = 2, 4, 8, 16, 16

    key = jax.random.PRNGKey(0)
    kx, kw, kb = jax.random.split(key, 3)
    x = jax.random.normal(kx, (N, Cin, H, W), dtype=jnp.float32)
    weight = jax.random.normal(kw, (Cin, Cout, 4, 4), dtype=jnp.float32) * 0.1
    bias = jax.random.normal(kb, (Cout,), dtype=jnp.float32) * 0.1

    ref = jax.block_until_ready(ref_conv_transpose(x, weight, bias))

    # f32-compute path vs HIGHEST-precision reference (tolerance leaves room for
    # the MXU's multi-pass bf16 f32 emulation).
    out_f32 = jax.block_until_ready(
        jax.jit(lambda a, w, b: upsample(a, w, b, compute_dtype=jnp.float32))(
            x, weight, bias))
    assert out_f32.shape == (N, Cout, 2 * H, 2 * W), out_f32.shape
    assert jnp.allclose(out_f32, ref, atol=5e-3, rtol=5e-3), "f32 mismatch vs reference"

    # Default bf16-compute path (f32 accumulation): looser tolerance by design.
    out_bf16 = jax.block_until_ready(jax.jit(upsample)(x, weight, bias))
    assert out_bf16.shape == (N, Cout, 2 * H, 2 * W), out_bf16.shape
    assert jnp.allclose(out_bf16, ref, atol=5e-2, rtol=5e-2), "bf16 mismatch vs reference"

    print("KERNEL_OK")
</pallas_src>

<mosaic_0001>
module attributes {stable_mosaic.version = 11 : i64} {
  func.func @upsample_kernel(%arg0: i32, %arg1: i32, %arg2: memref<1x1x10x18x4xf32, #tpu.memory_space<vmem>>, %arg3: memref<2x36x16xf32, #tpu.memory_space<vmem>>, %arg4: memref<1x16xf32, #tpu.memory_space<vmem>>, %arg5: memref<1x8x512xf32, #tpu.memory_space<vmem>>) attributes {dimension_semantics = [#tpu.dimension_semantics<parallel>, #tpu.dimension_semantics<parallel>], iteration_bounds = array<i64: 2, 2>, scalar_prefetch = 0 : i64, scratch_operands = 0 : i64, tpu.core_type = #tpu.core_type<tc>, window_params = [{transform_indices = @transform_0, window_bounds = array<i64: 1, 1, 10, 18, 4>}, {pipeline_mode = #tpu.pipeline_mode<synchronous>, transform_indices = @transform_1, window_bounds = array<i64: 2, 36, 16>}, {pipeline_mode = #tpu.pipeline_mode<synchronous>, transform_indices = @transform_2, window_bounds = array<i64: 1, 16>}, {transform_indices = @transform_3, window_bounds = array<i64: 1, 8, 512>}]} {
    %c0 = arith.constant 0 : index
    %c0_0 = arith.constant 0 : index
    %c0_1 = arith.constant 0 : index
    %c0_2 = arith.constant 0 : index
    %c0_3 = arith.constant 0 : index
    %0 = vector.load %arg2[%c0, %c0_0, %c0_1, %c0_2, %c0_3] : memref<1x1x10x18x4xf32, #tpu.memory_space<vmem>>, vector<1x1x8x16x4xf32>
    %1 = vector.shape_cast %0 : vector<1x1x8x16x4xf32> to vector<1x8x16x4xf32>
    %c0_4 = arith.constant 0 : index
    %c0_5 = arith.constant 0 : index
    %c0_6 = arith.constant 0 : index
    %c1 = arith.constant 1 : index
    %c0_7 = arith.constant 0 : index
    %2 = vector.load %arg2[%c0_4, %c0_5, %c0_6, %c1, %c0_7] : memref<1x1x10x18x4xf32, #tpu.memory_space<vmem>>, vector<1x1x8x16x4xf32>
    %3 = vector.shape_cast %2 : vector<1x1x8x16x4xf32> to vector<1x8x16x4xf32>
    %c0_8 = arith.constant 0 : index
    %c0_9 = arith.constant 0 : index
    %c0_10 = arith.constant 0 : index
    %c2 = arith.constant 2 : index
    %c0_11 = arith.constant 0 : index
    %4 = vector.load %arg2[%c0_8, %c0_9, %c0_10, %c2, %c0_11] : memref<1x1x10x18x4xf32, #tpu.memory_space<vmem>>, vector<1x1x8x16x4xf32>
    %5 = vector.shape_cast %4 : vector<1x1x8x16x4xf32> to vector<1x8x16x4xf32>
    %c0_12 = arith.constant 0 : index
    %c0_13 = arith.constant 0 : index
    %c1_14 = arith.constant 1 : index
    %c0_15 = arith.constant 0 : index
    %c0_16 = arith.constant 0 : index
    %6 = vector.load %arg2[%c0_12, %c0_13, %c1_14, %c0_15, %c0_16] : memref<1x1x10x18x4xf32, #tpu.memory_space<vmem>>, vector<1x1x8x16x4xf32>
    %7 = vector.shape_cast %6 : vector<1x1x8x16x4xf32> to vector<1x8x16x4xf32>
    %c0_17 = arith.constant 0 : index
    %c0_18 = arith.constant 0 : index
    %c1_19 = arith.constant 1 : index
    %c1_20 = arith.constant 1 : index
    %c0_21 = arith.constant 0 : index
    %8 = vector.load %arg2[%c0_17, %c0_18, %c1_19, %c1_20, %c0_21] : memref<1x1x10x18x4xf32, #tpu.memory_space<vmem>>, vector<1x1x8x16x4xf32>
    %9 = vector.shape_cast %8 : vector<1x1x8x16x4xf32> to vector<1x8x16x4xf32>
    %c0_22 = arith.constant 0 : index
    %c0_23 = arith.constant 0 : index
    %c1_24 = arith.constant 1 : index
    %c2_25 = arith.constant 2 : index
    %c0_26 = arith.constant 0 : index
    %10 = vector.load %arg2[%c0_22, %c0_23, %c1_24, %c2_25, %c0_26] : memref<1x1x10x18x4xf32, #tpu.memory_space<vmem>>, vector<1x1x8x16x4xf32>
    %11 = vector.shape_cast %10 : vector<1x1x8x16x4xf32> to vector<1x8x16x4xf32>
    %c0_27 = arith.constant 0 : index
    %c0_28 = arith.constant 0 : index
    %c2_29 = arith.constant 2 : index
    %c0_30 = arith.constant 0 : index
    %c0_31 = arith.constant 0 : index
    %12 = vector.load %arg2[%c0_27, %c0_28, %c2_29, %c0_30, %c0_31] : memref<1x1x10x18x4xf32, #tpu.memory_space<vmem>>, vector<1x1x8x16x4xf32>
    %13 = vector.shape_cast %12 : vector<1x1x8x16x4xf32> to vector<1x8x16x4xf32>
    %c0_32 = arith.constant 0 : index
    %c0_33 = arith.constant 0 : index
    %c2_34 = arith.constant 2 : index
    %c1_35 = arith.constant 1 : index
    %c0_36 = arith.constant 0 : index
    %14 = vector.load %arg2[%c0_32, %c0_33, %c2_34, %c1_35, %c0_36] : memref<1x1x10x18x4xf32, #tpu.memory_space<vmem>>, vector<1x1x8x16x4xf32>
    %15 = vector.shape_cast %14 : vector<1x1x8x16x4xf32> to vector<1x8x16x4xf32>
    %c0_37 = arith.constant 0 : index
    %c0_38 = arith.constant 0 : index
    %c2_39 = arith.constant 2 : index
    %c2_40 = arith.constant 2 : index
    %c0_41 = arith.constant 0 : index
    %16 = vector.load %arg2[%c0_37, %c0_38, %c2_39, %c2_40, %c0_41] : memref<1x1x10x18x4xf32, #tpu.memory_space<vmem>>, vector<1x1x8x16x4xf32>
    %17 = vector.shape_cast %16 : vector<1x1x8x16x4xf32> to vector<1x8x16x4xf32>
    %18 = tpu.concatenate %1, %3, %5, %7, %9, %11, %13, %15, %17 in 3 : vector<1x8x16x4xf32>, vector<1x8x16x4xf32>, vector<1x8x16x4xf32>, vector<1x8x16x4xf32>, vector<1x8x16x4xf32>, vector<1x8x16x4xf32>, vector<1x8x16x4xf32>, vector<1x8x16x4xf32>, vector<1x8x16x4xf32> -> vector<1x8x16x36xf32>
    %19 = vector.shape_cast %18 : vector<1x8x16x36xf32> to vector<128x36xf32>
    %c0_42 = arith.constant 0 : index
    %c0_43 = arith.constant 0 : index
    %20 = vector.load %arg4[%c0_42, %c0_43] : memref<1x16xf32, #tpu.memory_space<vmem>>, vector<1x16xf32>
    %c0_44 = arith.constant 0 : index
    %c0_45 = arith.constant 0 : index
    %c0_46 = arith.constant 0 : index
    %21 = vector.load %arg3[%c0_44, %c0_45, %c0_46] : memref<2x36x16xf32, #tpu.memory_space<vmem>>, vector<1x36x16xf32>
    %22 = vector.shape_cast %21 : vector<1x36x16xf32> to vector<36x16xf32>
    %cst = arith.constant dense<0.000000e+00> : vector<128x16xf32>
    %23 = tpu.matmul %19, %22, %cst {dimension_numbers = #tpu.dot_dimension_numbers<[1], [0], [0], [1], [0, 0, 1, 1], [], []>} : vector<128x36xf32>, vector<36x16xf32>, vector<128x16xf32> -> vector<128x16xf32>
    %24 = vector.broadcast %20 : vector<1x16xf32> to vector<128x16xf32>
    %25 = arith.addf %23, %24 : vector<128x16xf32>
    %26 = vector.shape_cast %25 : vector<128x16xf32> to vector<1x8x16x16xf32>
    %27 = vector.extract_strided_slice %26 {offsets = [0, 0, 0, 0], sizes = [1, 8, 1, 16], strides = [1, 1, 1, 1]} : vector<1x8x16x16xf32> to vector<1x8x1x16xf32>
    %28 = vector.shape_cast %27 : vector<1x8x1x16xf32> to vector<1x8x16xf32>
    %29 = vector.extract_strided_slice %26 {offsets = [0, 0, 1, 0], sizes = [1, 8, 1, 16], strides = [1, 1, 1, 1]} : vector<1x8x16x16xf32> to vector<1x8x1x16xf32>
    %30 = vector.shape_cast %29 : vector<1x8x1x16xf32> to vector<1x8x16xf32>
    %31 = vector.extract_strided_slice %26 {offsets = [0, 0, 2, 0], sizes = [1, 8, 1, 16], strides = [1, 1, 1, 1]} : vector<1x8x16x16xf32> to vector<1x8x1x16xf32>
    %32 = vector.shape_cast %31 : vector<1x8x1x16xf32> to vector<1x8x16xf32>
    %33 = vector.extract_strided_slice %26 {offsets = [0, 0, 3, 0], sizes = [1, 8, 1, 16], strides = [1, 1, 1, 1]} : vector<1x8x16x16xf32> to vector<1x8x1x16xf32>
    %34 = vector.shape_cast %33 : vector<1x8x1x16xf32> to vector<1x8x16xf32>
    %35 = vector.extract_strided_slice %26 {offsets = [0, 0, 4, 0], sizes = [1, 8, 1, 16], strides = [1, 1, 1, 1]} : vector<1x8x16x16xf32> to vector<1x8x1x16xf32>
    %36 = vector.shape_cast %35 : vector<1x8x1x16xf32> to vector<1x8x16xf32>
    %37 = vector.extract_strided_slice %26 {offsets = [0, 0, 5, 0], sizes = [1, 8, 1, 16], strides = [1, 1, 1, 1]} : vector<1x8x16x16xf32> to vector<1x8x1x16xf32>
    %38 = vector.shape_cast %37 : vector<1x8x1x16xf32> to vector<1x8x16xf32>
    %39 = vector.extract_strided_slice %26 {offsets = [0, 0, 6, 0], sizes = [1, 8, 1, 16], strides = [1, 1, 1, 1]} : vector<1x8x16x16xf32> to vector<1x8x1x16xf32>
    %40 = vector.shape_cast %39 : vector<1x8x1x16xf32> to vector<1x8x16xf32>
    %41 = vector.extract_strided_slice %26 {offsets = [0, 0, 7, 0], sizes = [1, 8, 1, 16], strides = [1, 1, 1, 1]} : vector<1x8x16x16xf32> to vector<1x8x1x16xf32>
    %42 = vector.shape_cast %41 : vector<1x8x1x16xf32> to vector<1x8x16xf32>
    %43 = vector.extract_strided_slice %26 {offsets = [0, 0, 8, 0], sizes = [1, 8, 1, 16], strides = [1, 1, 1, 1]} : vector<1x8x16x16xf32> to vector<1x8x1x16xf32>
    %44 = vector.shape_cast %43 : vector<1x8x1x16xf32> to vector<1x8x16xf32>
    %45 = vector.extract_strided_slice %26 {offsets = [0, 0, 9, 0], sizes = [1, 8, 1, 16], strides = [1, 1, 1, 1]} : vector<1x8x16x16xf32> to vector<1x8x1x16xf32>
    %46 = vector.shape_cast %45 : vector<1x8x1x16xf32> to vector<1x8x16xf32>
    %47 = vector.extract_strided_slice %26 {offsets = [0, 0, 10, 0], sizes = [1, 8, 1, 16], strides = [1, 1, 1, 1]} : vector<1x8x16x16xf32> to vector<1x8x1x16xf32>
    %48 = vector.shape_cast %47 : vector<1x8x1x16xf32> to vector<1x8x16xf32>
    %49 = vector.extract_strided_slice %26 {offsets = [0, 0, 11, 0], sizes = [1, 8, 1, 16], strides = [1, 1, 1, 1]} : vector<1x8x16x16xf32> to vector<1x8x1x16xf32>
    %50 = vector.shape_cast %49 : vector<1x8x1x16xf32> to vector<1x8x16xf32>
    %51 = vector.extract_strided_slice %26 {offsets = [0, 0, 12, 0], sizes = [1, 8, 1, 16], strides = [1, 1, 1, 1]} : vector<1x8x16x16xf32> to vector<1x8x1x16xf32>
    %52 = vector.shape_cast %51 : vector<1x8x1x16xf32> to vector<1x8x16xf32>
    %53 = vector.extract_strided_slice %26 {offsets = [0, 0, 13, 0], sizes = [1, 8, 1, 16], strides = [1, 1, 1, 1]} : vector<1x8x16x16xf32> to vector<1x8x1x16xf32>
    %54 = vector.shape_cast %53 : vector<1x8x1x16xf32> to vector<1x8x16xf32>
    %55 = vector.extract_strided_slice %26 {offsets = [0, 0, 14, 0], sizes = [1, 8, 1, 16], strides = [1, 1, 1, 1]} : vector<1x8x16x16xf32> to vector<1x8x1x16xf32>
    %56 = vector.shape_cast %55 : vector<1x8x1x16xf32> to vector<1x8x16xf32>
    %57 = vector.extract_strided_slice %26 {offsets = [0, 0, 15, 0], sizes = [1, 8, 1, 16], strides = [1, 1, 1, 1]} : vector<1x8x16x16xf32> to vector<1x8x1x16xf32>
    %58 = vector.shape_cast %57 : vector<1x8x1x16xf32> to vector<1x8x16xf32>
    %59 = tpu.concatenate %28, %30, %32, %34, %36, %38, %40, %42, %44, %46, %48, %50, %52, %54, %56, %58 in 2 : vector<1x8x16xf32>, vector<1x8x16xf32>, vector<1x8x16xf32>, vector<1x8x16xf32>, vector<1x8x16xf32>, vector<1x8x16xf32>, vector<1x8x16xf32>, vector<1x8x16xf32>, vector<1x8x16xf32>, vector<1x8x16xf32>, vector<1x8x16xf32>, vector<1x8x16xf32>, vector<1x8x16xf32>, vector<1x8x16xf32>, vector<1x8x16xf32>, vector<1x8x16xf32> -> vector<1x8x256xf32>
    %c0_47 = arith.constant 0 : index
    %c0_48 = arith.constant 0 : index
    %c0_49 = arith.constant 0 : index
    %60 = vector.load %arg5[%c0_47, %c0_48, %c0_49] : memref<1x8x512xf32, #tpu.memory_space<vmem>>, vector<1x8x256xf32>
    tpu.vector_store %arg5[%c0_47, %c0_48, %c0_49], %59 {strides = array<i32>} : memref<1x8x512xf32, #tpu.memory_space<vmem>>, vector<1x8x256xf32>,
    %c1_50 = arith.constant 1 : index
    %c0_51 = arith.constant 0 : index
    %c0_52 = arith.constant 0 : index
    %61 = vector.load %arg3[%c1_50, %c0_51, %c0_52] : memref<2x36x16xf32, #tpu.memory_space<vmem>>, vector<1x36x16xf32>
    %62 = vector.shape_cast %61 : vector<1x36x16xf32> to vector<36x16xf32>
    %cst_53 = arith.constant dense<0.000000e+00> : vector<128x16xf32>
    %63 = tpu.matmul %19, %62, %cst_53 {dimension_numbers = #tpu.dot_dimension_numbers<[1], [0], [0], [1], [0, 0, 1, 1], [], []>} : vector<128x36xf32>, vector<36x16xf32>, vector<128x16xf32> -> vector<128x16xf32>
    %64 = vector.broadcast %20 : vector<1x16xf32> to vector<128x16xf32>
    %65 = arith.addf %63, %64 : vector<128x16xf32>
    %66 = vector.shape_cast %65 : vector<128x16xf32> to vector<1x8x16x16xf32>
    %67 = vector.extract_strided_slice %66 {offsets = [0, 0, 0, 0], sizes = [1, 8, 1, 16], strides = [1, 1, 1, 1]} : vector<1x8x16x16xf32> to vector<1x8x1x16xf32>
    %68 = vector.shape_cast %67 : vector<1x8x1x16xf32> to vector<1x8x16xf32>
    %69 = vector.extract_strided_slice %66 {offsets = [0, 0, 1, 0], sizes = [1, 8, 1, 16], strides = [1, 1, 1, 1]} : vector<1x8x16x16xf32> to vector<1x8x1x16xf32>
    %70 = vector.shape_cast %69 : vector<1x8x1x16xf32> to vector<1x8x16xf32>
    %71 = vector.extract_strided_slice %66 {offsets = [0, 0, 2, 0], sizes = [1, 8, 1, 16], strides = [1, 1, 1, 1]} : vector<1x8x16x16xf32> to vector<1x8x1x16xf32>
    %72 = vector.shape_cast %71 : vector<1x8x1x16xf32> to vector<1x8x16xf32>
    %73 = vector.extract_strided_slice %66 {offsets = [0, 0, 3, 0], sizes = [1, 8, 1, 16], strides = [1, 1, 1, 1]} : vector<1x8x16x16xf32> to vector<1x8x1x16xf32>
    %74 = vector.shape_cast %73 : vector<1x8x1x16xf32> to vector<1x8x16xf32>
    %75 = vector.extract_strided_slice %66 {offsets = [0, 0, 4, 0], sizes = [1, 8, 1, 16], strides = [1, 1, 1, 1]} : vector<1x8x16x16xf32> to vector<1x8x1x16xf32>
    %76 = vector.shape_cast %75 : vector<1x8x1x16xf32> to vector<1x8x16xf32>
    %77 = vector.extract_strided_slice %66 {offsets = [0, 0, 5, 0], sizes = [1, 8, 1, 16], strides = [1, 1, 1, 1]} : vector<1x8x16x16xf32> to vector<1x8x1x16xf32>
    %78 = vector.shape_cast %77 : vector<1x8x1x16xf32> to vector<1x8x16xf32>
    %79 = vector.extract_strided_slice %66 {offsets = [0, 0, 6, 0], sizes = [1, 8, 1, 16], strides = [1, 1, 1, 1]} : vector<1x8x16x16xf32> to vector<1x8x1x16xf32>
    %80 = vector.shape_cast %79 : vector<1x8x1x16xf32> to vector<1x8x16xf32>
    %81 = vector.extract_strided_slice %66 {offsets = [0, 0, 7, 0], sizes = [1, 8, 1, 16], strides = [1, 1, 1, 1]} : vector<1x8x16x16xf32> to vector<1x8x1x16xf32>
    %82 = vector.shape_cast %81 : vector<1x8x1x16xf32> to vector<1x8x16xf32>
    %83 = vector.extract_strided_slice %66 {offsets = [0, 0, 8, 0], sizes = [1, 8, 1, 16], strides = [1, 1, 1, 1]} : vector<1x8x16x16xf32> to vector<1x8x1x16xf32>
    %84 = vector.shape_cast %83 : vector<1x8x1x16xf32> to vector<1x8x16xf32>
    %85 = vector.extract_strided_slice %66 {offsets = [0, 0, 9, 0], sizes = [1, 8, 1, 16], strides = [1, 1, 1, 1]} : vector<1x8x16x16xf32> to vector<1x8x1x16xf32>
    %86 = vector.shape_cast %85 : vector<1x8x1x16xf32> to vector<1x8x16xf32>
    %87 = vector.extract_strided_slice %66 {offsets = [0, 0, 10, 0], sizes = [1, 8, 1, 16], strides = [1, 1, 1, 1]} : vector<1x8x16x16xf32> to vector<1x8x1x16xf32>
    %88 = vector.shape_cast %87 : vector<1x8x1x16xf32> to vector<1x8x16xf32>
    %89 = vector.extract_strided_slice %66 {offsets = [0, 0, 11, 0], sizes = [1, 8, 1, 16], strides = [1, 1, 1, 1]} : vector<1x8x16x16xf32> to vector<1x8x1x16xf32>
    %90 = vector.shape_cast %89 : vector<1x8x1x16xf32> to vector<1x8x16xf32>
    %91 = vector.extract_strided_slice %66 {offsets = [0, 0, 12, 0], sizes = [1, 8, 1, 16], strides = [1, 1, 1, 1]} : vector<1x8x16x16xf32> to vector<1x8x1x16xf32>
    %92 = vector.shape_cast %91 : vector<1x8x1x16xf32> to vector<1x8x16xf32>
    %93 = vector.extract_strided_slice %66 {offsets = [0, 0, 13, 0], sizes = [1, 8, 1, 16], strides = [1, 1, 1, 1]} : vector<1x8x16x16xf32> to vector<1x8x1x16xf32>
    %94 = vector.shape_cast %93 : vector<1x8x1x16xf32> to vector<1x8x16xf32>
    %95 = vector.extract_strided_slice %66 {offsets = [0, 0, 14, 0], sizes = [1, 8, 1, 16], strides = [1, 1, 1, 1]} : vector<1x8x16x16xf32> to vector<1x8x1x16xf32>
    %96 = vector.shape_cast %95 : vector<1x8x1x16xf32> to vector<1x8x16xf32>
    %97 = vector.extract_strided_slice %66 {offsets = [0, 0, 15, 0], sizes = [1, 8, 1, 16], strides = [1, 1, 1, 1]} : vector<1x8x16x16xf32> to vector<1x8x1x16xf32>
    %98 = vector.shape_cast %97 : vector<1x8x1x16xf32> to vector<1x8x16xf32>
    %99 = tpu.concatenate %68, %70, %72, %74, %76, %78, %80, %82, %84, %86, %88, %90, %92, %94, %96, %98 in 2 : vector<1x8x16xf32>, vector<1x8x16xf32>, vector<1x8x16xf32>, vector<1x8x16xf32>, vector<1x8x16xf32>, vector<1x8x16xf32>, vector<1x8x16xf32>, vector<1x8x16xf32>, vector<1x8x16xf32>, vector<1x8x16xf32>, vector<1x8x16xf32>, vector<1x8x16xf32>, vector<1x8x16xf32>, vector<1x8x16xf32>, vector<1x8x16xf32>, vector<1x8x16xf32> -> vector<1x8x256xf32>
    %c0_54 = arith.constant 0 : index
    %c0_55 = arith.constant 0 : index
    %c256 = arith.constant 256 : index
    %100 = vector.load %arg5[%c0_54, %c0_55, %c256] : memref<1x8x512xf32, #tpu.memory_space<vmem>>, vector<1x8x256xf32>
    tpu.vector_store %arg5[%c0_54, %c0_55, %c256], %99 {strides = array<i32>} : memref<1x8x512xf32, #tpu.memory_space<vmem>>, vector<1x8x256xf32>,
    return
  }
  func.func @transform_0(%arg0: i32, %arg1: i32) -> (i32, i32, i32, i32, i32) {
    %c0_i32 = arith.constant 0 : i32
    %c0_i32_0 = arith.constant 0 : i32
    %c0_i32_1 = arith.constant 0 : i32
    %c0_i32_2 = arith.constant 0 : i32
    return %arg1, %arg0, %c0_i32, %c0_i32_0, %c0_i32_1 : i32, i32, i32, i32, i32
  }
  func.func @transform_1(%arg0: i32, %arg1: i32) -> (i32, i32, i32) {
    %c0_i32 = arith.constant 0 : i32
    %c0_i32_0 = arith.constant 0 : i32
    %c0_i32_1 = arith.constant 0 : i32
    %c0_i32_2 = arith.constant 0 : i32
    return %c0_i32, %c0_i32_0, %c0_i32_1 : i32, i32, i32
  }
  func.func @transform_2(%arg0: i32, %arg1: i32) -> (i32, i32) {
    %c0_i32 = arith.constant 0 : i32
    %c0_i32_0 = arith.constant 0 : i32
    %c0_i32_1 = arith.constant 0 : i32
    return %c0_i32, %c0_i32_0 : i32, i32
  }
  func.func @transform_3(%arg0: i32, %arg1: i32) -> (i32, i32, i32) {
    %c0_i32 = arith.constant 0 : i32
    %c0_i32_0 = arith.constant 0 : i32
    return %arg0, %arg1, %c0_i32 : i32, i32, i32
  }
}

</mosaic_0001>

<bundles_post_ra>
// kernel: tile.8
= control target key start
LH: loop header
LB: loop body
LE: loop exit
PB: predicated region body
PF: predicated region fallthrough
CT: control target
= control target key end

     0   :  { %s22_s0 = inlined_call_operand.vmem [shape: f32[8], index: 0, kind: input, shape index: {}]   ;;  %s23_s1 = inlined_call_operand.vmem [shape: f32[2,8], index: 1, kind: output, shape index: {}]  }
   0x1   :  { %v4_v0 = vld [vmem:[%s22_s0] ss:$0 sm:$0xff] }
   0x2   :  { %5 = vst [vmem:[%s23_s1] sm:$0x3] %v4_v0 }

// kernel: tile.9
= control target key start
LH: loop header
LB: loop body
LE: loop exit
PB: predicated region body
PF: predicated region fallthrough
CT: control target
= control target key end

     0   :  { %vm8_vm0 = vcmask 64512   ;;  %vm14_vm1 = vcmask 130112   ;;  %s42_s0 = inlined_call_operand.vmem [shape: f32[2,8], index: 0, kind: input, shape index: {}]   ;;  %s43_s1 = inlined_call_operand.vmem [shape: f32[1,16], index: 1, kind: output, shape index: {}]  }
   0x1   :  { %v5_v0 = vld [vmem:[%s42_s0] sm:$0x3]  ;;  %s25_s0 = smov 8  }
   0x2   :  { %6 = vst [vmem:[#allocation1] sm:$0x3] %v5_v0 }
   0x9   :  { %v11_v1 = vld [vmem:[#allocation1 + $0x1] sm:$0x1]   ;;  %v7_v2 = vld [vmem:[#allocation1] sm:$0x1]  }
   0xa   :  { %12 = vrot.lane.b32.xlu0 %v11_v1, %s25_s0  ;;  %9 = vst.msk [vmem:[#allocation0] sm:$0x1] %vm8_vm0, %v7_v2  }
  0x7c   :  { %v13_v3 = vpop.permute.xlu0 %12  }
  0x7d   :  { %15 = vst.msk [vmem:[#allocation0] sm:$0x1] %vm14_vm1, %v13_v3  }
  0x84   :  { %v20_v4 = vld [vmem:[#allocation0] sm:$0x1] }
  0x85   :  { %23 = vst [vmem:[%s43_s1] sm:$0x1] %v20_v4 }

// kernel: _lambda_.1
= control target key start
LH: loop header
LB: loop body
LE: loop exit
PB: predicated region body
PF: predicated region fallthrough
CT: control target
= control target key end

     0   :  { %s2457_s12 = smov 0   ;;  %s2459_s13 = smov 0   ;;  %s3864_s0 = inlined_call_operand.vmem [shape: f32[2,2,10,18,4], index: 0, kind: input, shape index: {}]   ;;  %s3865_s1 = inlined_call_operand.vmem [shape: f32[2,36,16], index: 1, kind: input, shape index: {}]   ;;  %s3866_s2 = inlined_call_operand.vmem [shape: f32[1,16], index: 2, kind: input, shape index: {}]   ;;  %s3867_s3 = inlined_call_operand.vmem [shape: f32[2,16,512], index: 3, kind: output, shape index: {}]  }
   0x1   :  { %s2461_s14 = smov 0   ;;  %s2463_s15 = smov 0  }
   0x2   :  { %s2465_s16 = smov 0  }
   0x3 LB: > { %s22_s17 = sadd.s32 1, %s2414_s14  ;;  %s25_s18 = sadd.s32 1, %s2418_s15  ;;  %s2422_s16 = sphi %s2465_s16, %s13_s16   ;;  %s2418_s15 = sphi %s2463_s15, %s3907_s15   ;;  %s2414_s14 = sphi %s2461_s14, %s3906_s14   ;;  %s2410_s13 = sphi %s2459_s13, %s3905_s13   ;;  %s2406_s12 = sphi %s2457_s12, %s3904_s12  }
   0x4   : > { %p23_p0 = scmp.ge.s32.totalorder %s22_s17, 2  ;;  %p2076_p1 = scmp.ge.s32.totalorder %s2422_s16, 1 }
   0x5   : > { %p157_p2 = scmp.lt.s32.totalorder %s2422_s16, 5 }
   0x6   : > { %s3909_s17 = smov (%p23_p0, %s22_s17), 0  ;;  %s3911_s18 = smov (!%p23_p0, %s25_s18), %s2418_s15 }
   0x7   : > { %p158_p3 = pnand %p2076_p1, %p157_p2  ;;  %p27_p4 = scmp.ge.s32.totalorder %s3911_s18, 2 }
   0x9   : > { %s3913_s18 = smov (%p27_p4, %s3911_s18), 0  ;;  %161 = sbr.rel (%p158_p3) target bundleno = 761 (0x2f9), region = 32 }
   0xe   : > { %p189_p5 = scmp.lt.s32.totalorder %s2406_s12, 1  ;;  %p191_p6 = scmp.lt.s32.totalorder %s2410_s13, 1  ;;  %v1006_v11 = vld [vmem:[%s3865_s1 + $0x20] sm:$0xf]  ;;  %vm1062_vm0 = vcmask 1043456   ;;  %v1005_v13 = vld [vmem:[%s3865_s1 + $0x18] sm:$0xff] }
   0xf   : > { %s2424_s26 = smov 8   ;;  %s2425_s27 = smov 4   ;;  %v2199_v12 = vld [vmem:[%s3865_s1 + $0x48] sm:$0xf]  ;;  %2261 = vmatprep.subr.msk.mxu0 %vm1062_vm0, %v1006_v11  ;;  %v2198_v14 = vld [vmem:[%s3865_s1 + $0x40] sm:$0xff]  ;;  %v1004_v17 = vld [vmem:[%s3865_s1 + $0x10] sm:$0xff] }
  0x10   : > { %s3915_s12 = smov (!%p189_p5, %s2406_s12), 1  ;;  %s3917_s13 = smov (!%p191_p6, %s2410_s13), 1  ;;  %2295 = vmatprep.subr.msk.mxu1 %vm1062_vm0, %v2199_v12  ;;  %2262 = vmatpush3.msk.msra.mxu0 %vm1062_vm0, %v1006_v11  ;;  %v2197_v18 = vld [vmem:[%s3865_s1 + $0x38] sm:$0xff]  ;;  %v1003_v19 = vld [vmem:[%s3865_s1 + $0x8] sm:$0xff]  ;;  %v2196_v20 = vld [vmem:[%s3865_s1 + $0x30] sm:$0xff]  ;;  %vm865_vm1 = vcmask 31744  }
  0x11   : > { %s2330_s19 = smul.u32 60, %s3915_s12  ;;  %s2426_s28 = smov 12   ;;  %2296 = vmatpush3.msk.msra.mxu1 %vm1062_vm0, %v2199_v12  ;;  %2263 = vmatprep.subr.mxu0 %v1005_v13  ;;  %v1002_v21 = vld [vmem:[%s3865_s1] sm:$0xff]  ;;  %v2195_v22 = vld [vmem:[%s3865_s1 + $0x28] sm:$0xff]  ;;  %vm882_vm2 = vcmask 64512   ;;  %vm899_vm3 = vcmask 97280  }
  0x12   : > { %s2329_s20 = smul.u32 30, %s3917_s13  ;;  %s2427_s29 = smov 16   ;;  %2297 = vmatprep.subr.mxu1 %v2198_v14  ;;  %2264 = vmatpush3.msra.mxu0 %v1005_v13  ;;  %vm916_vm4 = vcmask 130048   ;;  %vm933_vm5 = vcmask 162816   ;;  %vm950_vm6 = vcmask 195584   ;;  %vm967_vm7 = vcmask 228352  }
  0x13   : > { %s2428_s30 = smov 20   ;;  %s2429_s4 = smov 24   ;;  %2298 = vmatpush3.msra.mxu1 %v2198_v14  ;;  %2265 = vmatprep.subr.mxu0 %v1004_v17  ;;  %vm984_vm8 = vcmask 261120   ;;  %vm1013_vm9 = vcmask 293888   ;;  %vm1220_vm10 = vcmask 1041409   ;;  %vm1223_vm11 = vcmask 1042434  }
  0x14   : > { %s195_s21 = sadd.s32 %s2330_s19, %s2329_s20  ;;  %2299 = vmatprep.subr.mxu1 %v2197_v18  ;;  %s2430_s8 = smov 28   ;;  %2266 = vmatpush3.msra.mxu0 %v1004_v17  ;;  %vm1226_vm12 = vcmask 1043459   ;;  %vm1229_vm13 = vcmask 1044484   ;;  %vm1232_vm14 = vcmask 1045509   ;;  %vm1238_vm15 = vcmask 1047559  }
  0x15   : > { %s2077_s22 = sshll.u32 %s195_s21, 3  ;;  %2300 = vmatpush3.msra.mxu1 %v2197_v18  ;;  %2267 = vmatprep.subr.mxu0 %v1003_v19  ;;  %s2431_s20 = smov 32   ;;  %vm1235_vm0 = vcmask 1046534  }
  0x16   : > { %s2496_s25 = scalar_lea.vmem %s3864_s0, %s2077_s22  ;;  %2301 = vmatprep.subr.mxu1 %v2196_v20  ;;  %2268 = vmatpush3.msra.mxu0 %v1003_v19  ;;  %s2078_s21 = sshll.u32 %s3915_s12, 2 }
  0x17   : > { %v239_v0 = vld [vmem:[%s2496_s25 + $0x2] sm:$0xff]  ;;  %v240_v2 = vld [vmem:[%s2496_s25 + $0xa] sm:$0xff]  ;;  %v2510_v5 = vld [vmem:[%s2496_s25 + $0x18] sm:$0xff]  ;;  %2302 = vmatpush3.msra.mxu1 %v2196_v20  ;;  %2269 = vmatprep.subr.mxu0 %v1002_v21  ;;  %s2079_s22 = sshll.u32 %s3917_s13, 3 }
  0x18   : > { %v223_v1 = vld [vmem:[%s2496_s25 + $0x1] sm:$0xff]  ;;  %433 = vrot.lane.b32.xlu1 %v239_v0, %s2424_s26  ;;  %v224_v3 = vld [vmem:[%s2496_s25 + $0x9] sm:$0xff]  ;;  %v225_v6 = vld [vmem:[%s2496_s25 + $0x19] sm:$0xff]  ;;  %2303 = vmatprep.subr.mxu1 %v2195_v22  ;;  %s204_s23 = sadd.s32 %s2079_s22, %s2078_s21 }
  0x19   : > { %369 = vrot.lane.b32.xlu0 %v223_v1, %s2425_s27  ;;  %v2507_v4 = vld [vmem:[%s2496_s25 + $0x20] sm:$0xff]  ;;  %v2526_v9 = vld [vmem:[%s2496_s25 + $0x30] sm:$0xff]  ;;  %v2549_v16 = vld [vmem:[%s2496_s25 + $0x38] sm:$0xff]  ;;  %2270 = vmatpush3.msra.mxu0 %v1002_v21  ;;  %s2080_s24 = sshll.u32 %s204_s23, 3 }
  0x1a   : > { %v2113_v7 = vld [vmem:[%s2496_s25 + $0x1a] sm:$0xff]  ;;  %v2114_v10 = vld [vmem:[%s2496_s25 + $0x22] sm:$0xff]  ;;  %v2145_v15 = vld [vmem:[%s2496_s25 + $0x31] sm:$0xff]  ;;  %2304 = vmatpush3.msra.mxu1 %v2195_v22  ;;  %s206_s5 = scalar_lea.vmem %s3867_s3, %s2080_s24 }
  0x1b   : > { %v2098_v8 = vld [vmem:[%s2496_s25 + $0x21] sm:$0xff]  ;;  %v2161_v23 = vld [vmem:[%s2496_s25 + $0x32] sm:$0xff]  ;;  %v2147_v27 = vld [vmem:[%s2496_s25 + $0x49] sm:$0xff] }
  0x1c   : > { %435 = vrot.lane.b32.xlu1 %v240_v2, %s2424_s26  ;;  %v2146_v24 = vld [vmem:[%s2496_s25 + $0x39] sm:$0xff]  ;;  %v2587_v26 = vld [vmem:[%s2496_s25 + $0x48] sm:$0xff]  ;;  %v2597_v28 = vld [vmem:[%s2496_s25 + $0x50] sm:$0xff] }
  0x1d   : > { %371 = vrot.lane.b32.xlu0 %v224_v3, %s2425_s27  ;;  %v2162_v25 = vld [vmem:[%s2496_s25 + $0x3a] sm:$0xff]  ;;  %v2163_v29 = vld [vmem:[%s2496_s25 + $0x4a] sm:$0xff]  ;;  %v2164_v31 = vld [vmem:[%s2496_s25 + $0x52] sm:$0xff] }
  0x1e   : > { %v2148_v30 = vld [vmem:[%s2496_s25 + $0x51] sm:$0xff]  ;;  %v2617_v32 = vld [vmem:[%s2496_s25 + $0x60] sm:$0xff]  ;;  %v2627_v34 = vld [vmem:[%s2496_s25 + $0x68] sm:$0xff] }
  0x1f   : > { %v2149_v33 = vld [vmem:[%s2496_s25 + $0x61] sm:$0xff]  ;;  %v2150_v36 = vld [vmem:[%s2496_s25 + $0x69] sm:$0xff]  ;;  %v2647_v40 = vld [vmem:[%s2496_s25 + $0x78] sm:$0xff] }
  0x20   : > { %499 = vrot.lane.b32.xlu1 %v2507_v4, %s2426_s28  ;;  %v2165_v35 = vld [vmem:[%s2496_s25 + $0x62] sm:$0xff]  ;;  %v2166_v37 = vld [vmem:[%s2496_s25 + $0x6a] sm:$0xff]  ;;  %v2151_v45 = vld [vmem:[%s2496_s25 + $0x79] sm:$0xff] }
  0x21   : > { %497 = vrot.lane.b32.xlu0 %v2510_v5, %s2426_s28  ;;  %v2661_v46 = vld [vmem:[%s2496_s25 + $0x80] sm:$0xff]  ;;  %v2694_v1 = vld [vmem:[%s2496_s25 + $0x90] sm:$0xff]  ;;  %v2720_v20 = vld [vmem:[%s2496_s25 + $0x98] sm:$0xff] }
  0x22   : > { %v2167_v51 = vld [vmem:[%s2496_s25 + $0x7a] sm:$0xff]  ;;  %v2168_v57 = vld [vmem:[%s2496_s25 + $0x82] sm:$0xff]  ;;  %v2153_v19 = vld [vmem:[%s2496_s25 + $0x91] sm:$0xff] }
  0x23   : > { %v2152_v52 = vld [vmem:[%s2496_s25 + $0x81] sm:$0xff] }
  0x24   : > { %373 = vrot.lane.b32.xlu1 %v225_v6, %s2425_s27  ;;  %v207_v60 = vld [vmem:[%s2496_s25] sm:$0xff] }
  0x25   : > { %561 = vrot.lane.b32.xlu0 %v225_v6, %s2427_s29 }
  0x28   : > { %625 = vrot.lane.b32.xlu1 %v2113_v7, %s2428_s30 }
  0x29   : > { %563 = vrot.lane.b32.xlu0 %v2098_v8, %s2427_s29 }
  0x2c   : > { %437 = vrot.lane.b32.xlu1 %v2113_v7, %s2424_s26  ;;  %v208_v7 = vld [vmem:[%s2496_s25 + $0x8] sm:$0xff] }
  0x2d   : > { %375 = vrot.lane.b32.xlu0 %v2098_v8, %s2425_s27 }
  0x30   : > { %689 = vrot.lane.b32.xlu1 %v2526_v9, %s2429_s4 }
  0x31   : > { %627 = vrot.lane.b32.xlu0 %v2114_v10, %s2428_s30 }
  0x34   : > { %501 = vrot.lane.b32.xlu1 %v2526_v9, %s2426_s28 }
  0x35   : > { %439 = vrot.lane.b32.xlu0 %v2114_v10, %s2424_s26 }
  0x38   : > { %753 = vrot.lane.b32.xlu1 %v2145_v15, %s2430_s8 }
  0x39   : > { %691 = vrot.lane.b32.xlu0 %v2549_v16, %s2429_s4 }
  0x3c   : > { %565 = vrot.lane.b32.xlu1 %v2145_v15, %s2427_s29 }
  0x3d   : > { %503 = vrot.lane.b32.xlu0 %v2549_v16, %s2426_s28 }
  0x40   : > { %817 = vrot.lane.b32.xlu1 %v2161_v23, %s2431_s20 }
  0x41   : > { %755 = vrot.lane.b32.xlu0 %v2146_v24, %s2430_s8 }
  0x44   : > { %567 = vrot.lane.b32.xlu1 %v2146_v24, %s2427_s29 }
  0x45   : > { %377 = vrot.lane.b32.xlu0 %v2145_v15, %s2425_s27 }
  0x48   : > { %819 = vrot.lane.b32.xlu1 %v2162_v25, %s2431_s20 }
  0x49   : > { %629 = vrot.lane.b32.xlu0 %v2161_v23, %s2428_s30 }
  0x4c   : > { %441 = vrot.lane.b32.xlu1 %v2161_v23, %s2424_s26 }
  0x4d   : > { %379 = vrot.lane.b32.xlu0 %v2146_v24, %s2425_s27 }
  0x50   : > { %693 = vrot.lane.b32.xlu1 %v2587_v26, %s2429_s4 }
  0x51   : > { %631 = vrot.lane.b32.xlu0 %v2162_v25, %s2428_s30 }
  0x54   : > { %505 = vrot.lane.b32.xlu1 %v2587_v26, %s2426_s28 }
  0x55   : > { %443 = vrot.lane.b32.xlu0 %v2162_v25, %s2424_s26 }
  0x58   : > { %757 = vrot.lane.b32.xlu1 %v2147_v27, %s2430_s8 }
  0x59   : > { %695 = vrot.lane.b32.xlu0 %v2597_v28, %s2429_s4 }
  0x5c   : > { %569 = vrot.lane.b32.xlu1 %v2147_v27, %s2427_s29 }
  0x5d   : > { %507 = vrot.lane.b32.xlu0 %v2597_v28, %s2426_s28 }
  0x60   : > { %821 = vrot.lane.b32.xlu1 %v2163_v29, %s2431_s20 }
  0x61   : > { %759 = vrot.lane.b32.xlu0 %v2148_v30, %s2430_s8 }
  0x64   : > { %571 = vrot.lane.b32.xlu1 %v2148_v30, %s2427_s29 }
  0x65   : > { %381 = vrot.lane.b32.xlu0 %v2147_v27, %s2425_s27 }
  0x68   : > { %823 = vrot.lane.b32.xlu1 %v2164_v31, %s2431_s20 }
  0x69   : > { %633 = vrot.lane.b32.xlu0 %v2163_v29, %s2428_s30 }
  0x6c   : > { %445 = vrot.lane.b32.xlu1 %v2163_v29, %s2424_s26 }
  0x6d   : > { %383 = vrot.lane.b32.xlu0 %v2148_v30, %s2425_s27 }
  0x70   : > { %697 = vrot.lane.b32.xlu1 %v2617_v32, %s2429_s4 }
  0x71   : > { %635 = vrot.lane.b32.xlu0 %v2164_v31, %s2428_s30 }
  0x74   : > { %509 = vrot.lane.b32.xlu1 %v2617_v32, %s2426_s28 }
  0x75   : > { %447 = vrot.lane.b32.xlu0 %v2164_v31, %s2424_s26 }
  0x78   : > { %761 = vrot.lane.b32.xlu1 %v2149_v33, %s2430_s8 }
  0x79   : > { %699 = vrot.lane.b32.xlu0 %v2627_v34, %s2429_s4 }
  0x7c   : > { %573 = vrot.lane.b32.xlu1 %v2149_v33, %s2427_s29 }
  0x7d   : > { %511 = vrot.lane.b32.xlu0 %v2627_v34, %s2426_s28 }
  0x80   : > { %825 = vrot.lane.b32.xlu1 %v2165_v35, %s2431_s20 }
  0x81   : > { %763 = vrot.lane.b32.xlu0 %v2150_v36, %s2430_s8 }
  0x84   : > { %575 = vrot.lane.b32.xlu1 %v2150_v36, %s2427_s29 }
  0x85   : > { %385 = vrot.lane.b32.xlu0 %v2149_v33, %s2425_s27 }
  0x88   : > { %827 = vrot.lane.b32.xlu1 %v2166_v37, %s2431_s20 }
  0x89   : > { %637 = vrot.lane.b32.xlu0 %v2165_v35, %s2428_s30 }
  0x8a   : > { %v434_v38 = vpop.permute.xlu1 %433 }
  0x8b   : > { %v370_v39 = vpop.permute.xlu0 %369 }
  0x8c   : > { %449 = vrot.lane.b32.xlu1 %v2165_v35, %s2424_s26  ;;  %v866_v61 = vsel %vm865_vm1, %v207_v60, %v370_v39  ;;  %v2169_v35 = vld [vmem:[%s2496_s25 + $0x92] sm:$0xff] }
  0x8d   : > { %387 = vrot.lane.b32.xlu0 %v2150_v36, %s2425_s27  ;;  %v883_v0 = vsel %vm882_vm2, %v866_v61, %v434_v38  ;;  %v2154_v36 = vld [vmem:[%s2496_s25 + $0x99] sm:$0xff] }
  0x8e   : > { %v2649_v41 = vpop.permute.xlu1 %435 }
  0x8f   : > { %v372_v42 = vpop.permute.xlu0 %371 }
  0x90   : > { %701 = vrot.lane.b32.xlu1 %v2647_v40, %s2429_s4  ;;  %v867_v12 = vsel %vm865_vm1, %v208_v7, %v372_v42  ;;  %v2170_v42 = vld [vmem:[%s2496_s25 + $0x9a] sm:$0xff] }
  0x91   : > { %639 = vrot.lane.b32.xlu0 %v2166_v37, %s2428_s30  ;;  %v884_v18 = vsel %vm882_vm2, %v867_v12, %v2649_v41 }
  0x92   : > { %v2654_v43 = vpop.permute.xlu1 %499 }
  0x93   : > { %v498_v44 = vpop.permute.xlu0 %497  ;;  %v901_v21 = vsel %vm899_vm3, %v884_v18, %v2654_v43 }
  0x94   : > { %513 = vrot.lane.b32.xlu1 %v2647_v40, %s2426_s28  ;;  %v900_v2 = vsel %vm899_vm3, %v883_v0, %v498_v44  ;;  %v2155_v0 = vld [vmem:[%s2496_s25 + $0xa9] sm:$0xff] }
  0x95   : > { %451 = vrot.lane.b32.xlu0 %v2166_v37, %s2424_s26 }
  0x96   : > { %v2663_v47 = vpop.permute.xlu1 %373 }
  0x97   : > { %v562_v48 = vpop.permute.xlu0 %561 }
  0x98   : > { %765 = vrot.lane.b32.xlu1 %v2151_v45, %s2430_s8  ;;  %v917_v8 = vsel %vm916_vm4, %v900_v2, %v562_v48  ;;  %v2791_v2 = vld [vmem:[%s2496_s25 + $0xb0] sm:$0xff] }
  0x99   : > { %703 = vrot.lane.b32.xlu0 %v2661_v46, %s2429_s4 }
  0x9a   : > { %v626_v49 = vpop.permute.xlu1 %625 }
  0x9b   : > { %v564_v50 = vpop.permute.xlu0 %563  ;;  %v934_v10 = vsel %vm933_vm5, %v917_v8, %v626_v49  ;;  %v868_v49 = vsel %vm865_vm1, %v2510_v5, %v2663_v47 }
  0x9c   : > { %577 = vrot.lane.b32.xlu1 %v2151_v45, %s2427_s29  ;;  %v918_v24 = vsel %vm916_vm4, %v901_v21, %v564_v50  ;;  %v2172_v21 = vld [vmem:[%s2496_s25 + $0xb2] sm:$0xff] }
  0x9d   : > { %515 = vrot.lane.b32.xlu0 %v2661_v46, %s2426_s28 }
  0x9e   : > { %v2673_v53 = vpop.permute.xlu1 %437 }
  0x9f   : > { %v2675_v54 = vpop.permute.xlu0 %375  ;;  %v885_v50 = vsel %vm882_vm2, %v868_v49, %v2673_v53  ;;  %v2157_v49 = vld [vmem:[%s2496_s25 + $0xc1] sm:$0xff] }
  0xa0   : > { %829 = vrot.lane.b32.xlu1 %v2167_v51, %s2431_s20 }
  0xa1   : > { %767 = vrot.lane.b32.xlu0 %v2152_v52, %s2430_s8 }
  0xa2   : > { %v690_v55 = vpop.permute.xlu1 %689 }
  0xa3   : > { %v628_v56 = vpop.permute.xlu0 %627  ;;  %v951_v11 = vsel %vm950_vm6, %v934_v10, %v690_v55 }
  0xa4   : > { %579 = vrot.lane.b32.xlu1 %v2152_v52, %s2427_s29  ;;  %v935_v25 = vsel %vm933_vm5, %v918_v24, %v628_v56 }
  0xa5   : > { %389 = vrot.lane.b32.xlu0 %v2151_v45, %s2425_s27 }
  0xa6   : > { %v2682_v58 = vpop.permute.xlu1 %501 }
  0xa7   : > { %v2684_v59 = vpop.permute.xlu0 %439 }
  0xa8   : > { %831 = vrot.lane.b32.xlu1 %v2168_v57, %s2431_s20 }
  0xa9   : > { %641 = vrot.lane.b32.xlu0 %v2167_v51, %s2428_s30 }
  0xaa   : > { %v754_v62 = vpop.permute.xlu1 %753 }
  0xab   : > { %v692_v63 = vpop.permute.xlu0 %691  ;;  %v968_v13 = vsel %vm967_vm7, %v951_v11, %v754_v62  ;;  %v869_v62 = vsel %vm865_vm1, %v2507_v4, %v2675_v54 }
  0xac   : > { %453 = vrot.lane.b32.xlu1 %v2167_v51, %s2424_s26  ;;  %v952_v27 = vsel %vm950_vm6, %v935_v25, %v692_v63  ;;  %v2764_v51 = vld [vmem:[%s2496_s25 + $0xa8] sm:$0xff]  ;;  %v886_v63 = vsel %vm882_vm2, %v869_v62, %v2684_v59 }
  0xad   : > { %391 = vrot.lane.b32.xlu0 %v2152_v52, %s2425_s27  ;;  %v902_v52 = vsel %vm899_vm3, %v885_v50, %v2682_v58  ;;  %v2142_v50 = vld [vmem:[%s2496_s25 + $0xc8] sm:$0xff] }
  0xae   : > { %v2697_v3 = vpop.permute.xlu1 %565 }
  0xaf   : > { %v2699_v6 = vpop.permute.xlu0 %503 }
  0xb0   : > { %705 = vrot.lane.b32.xlu1 %v2694_v1, %s2429_s4 }
  0xb1   : > { %643 = vrot.lane.b32.xlu0 %v2168_v57, %s2428_s30 }
  0xb2   : > { %v818_v14 = vpop.permute.xlu1 %817 }
  0xb3   : > { %v756_v15 = vpop.permute.xlu0 %755  ;;  %v985_v17 = vsel %vm984_vm8, %v968_v13, %v818_v14  ;;  %v2171_v13 = vld [vmem:[%s2496_s25 + $0xaa] sm:$0xff] }
  0xb4   : > { %517 = vrot.lane.b32.xlu1 %v2694_v1, %s2426_s28  ;;  %2271 = vmatprep.mubr.msk.f32.mxu0 %vm1013_vm9, %v985_v17  ;;  %v969_v29 = vsel %vm967_vm7, %v952_v27, %v756_v15  ;;  %v2156_v14 = vld [vmem:[%s2496_s25 + $0xb1] sm:$0xff] }
  0xb5   : > { %455 = vrot.lane.b32.xlu0 %v2168_v57, %s2424_s26  ;;  %2305 = vmatprep.mubr.msk.f32.mxu1 %vm1013_vm9, %v985_v17  ;;  %v919_v57 = vsel %vm916_vm4, %v902_v52, %v2697_v3  ;;  %v903_v3 = vsel %vm899_vm3, %v886_v63, %v2699_v6 }
  0xb6   : > { %v568_v22 = vpop.permute.xlu1 %567 }
  0xb7   : > { %v2724_v23 = vpop.permute.xlu0 %377  ;;  %v920_v7 = vsel %vm916_vm4, %v903_v3, %v568_v22  ;;  %v2128_v3 = vld [vmem:[%s2496_s25 + $0xca] sm:$0xff] }
  0xb8   : > { %769 = vrot.lane.b32.xlu1 %v2153_v19, %s2430_s8 }
  0xb9   : > { %707 = vrot.lane.b32.xlu0 %v2720_v20, %s2429_s4 }
  0xba   : > { %v820_v30 = vpop.permute.xlu1 %819 }
  0xbb   : > { %v630_v31 = vpop.permute.xlu0 %629  ;;  %v986_v33 = vsel %vm984_vm8, %v969_v29, %v820_v30  ;;  %v870_v29 = vsel %vm865_vm1, %v2526_v9, %v2724_v23 }
  0xbc   : > { %581 = vrot.lane.b32.xlu1 %v2153_v19, %s2427_s29  ;;  %2272 = vmatmul.mubr.msk.f32.vlgmr.msra.gmra.mxu0 %vm1013_vm9, %v986_v33  ;;  %v936_v5 = vsel %vm933_vm5, %v919_v57, %v630_v31  ;;  %v2141_v31 = vld [vmem:[%s2496_s25 + $0xc0] sm:$0xff] }
  0xbd   : > { %519 = vrot.lane.b32.xlu0 %v2720_v20, %s2426_s28  ;;  %2306 = vmatmul.mubr.msk.f32.vlgmr.msra.gmra.mxu1 %vm1013_vm9, %v986_v33 }
  0xbe   : > { %v2741_v37 = vpop.permute.xlu1 %441 }
  0xbf   : > { %v2743_v38 = vpop.permute.xlu0 %379  ;;  %v887_v30 = vsel %vm882_vm2, %v870_v29, %v2741_v37 }
  0xc0   : > { %833 = vrot.lane.b32.xlu1 %v2169_v35, %s2431_s20 }
  0xc1   : > { %771 = vrot.lane.b32.xlu0 %v2154_v36, %s2430_s8 }
  0xc2   : > { %v694_v39 = vpop.permute.xlu1 %693 }
  0xc3   : > { %v632_v41 = vpop.permute.xlu0 %631  ;;  %v953_v47 = vsel %vm950_vm6, %v936_v5, %v694_v39 }
  0xc4   : > { %583 = vrot.lane.b32.xlu1 %v2154_v36, %s2427_s29  ;;  %v937_v8 = vsel %vm933_vm5, %v920_v7, %v632_v41 }
  0xc5   : > { %393 = vrot.lane.b32.xlu0 %v2153_v19, %s2425_s27 }
  0xc6   : > { %v2750_v43 = vpop.permute.xlu1 %505 }
  0xc7   : > { %v2752_v44 = vpop.permute.xlu0 %443  ;;  %v904_v33 = vsel %vm899_vm3, %v887_v30, %v2750_v43 }
  0xc8   : > { %835 = vrot.lane.b32.xlu1 %v2170_v42, %s2431_s20 }
  0xc9   : > { %645 = vrot.lane.b32.xlu0 %v2169_v35, %s2428_s30 }
  0xca   : > { %v758_v45 = vpop.permute.xlu1 %757 }
  0xcb   : > { %v696_v48 = vpop.permute.xlu0 %695  ;;  %v970_v53 = vsel %vm967_vm7, %v953_v47, %v758_v45  ;;  %v871_v45 = vsel %vm865_vm1, %v2549_v16, %v2743_v38 }
  0xcc   : > { %457 = vrot.lane.b32.xlu1 %v2169_v35, %s2424_s26  ;;  %v954_v59 = vsel %vm950_vm6, %v937_v8, %v696_v48  ;;  %v888_v48 = vsel %vm882_vm2, %v871_v45, %v2752_v44  ;;  %v2144_v8 = vld [vmem:[%s2496_s25 + $0xe0] sm:$0xff] }
  0xcd   : > { %395 = vrot.lane.b32.xlu0 %v2154_v36, %s2425_s27 }
  0xce   : > { %v570_v55 = vpop.permute.xlu1 %569 }
  0xcf   : > { %v2768_v56 = vpop.permute.xlu0 %507  ;;  %v921_v39 = vsel %vm916_vm4, %v904_v33, %v570_v55 }
  0xd0   : > { %709 = vrot.lane.b32.xlu1 %v2764_v51, %s2429_s4  ;;  %v905_v52 = vsel %vm899_vm3, %v888_v48, %v2768_v56 }
  0xd1   : > { %647 = vrot.lane.b32.xlu0 %v2170_v42, %s2428_s30 }
  0xd2   : > { %v822_v58 = vpop.permute.xlu1 %821 }
  0xd3   : > { %v760_v60 = vpop.permute.xlu0 %759  ;;  %v987_v61 = vsel %vm984_vm8, %v970_v53, %v822_v58  ;;  %v2173_v58 = vld [vmem:[%s2496_s25 + $0xc2] sm:$0xff] }
  0xd4   : > { %521 = vrot.lane.b32.xlu1 %v2764_v51, %s2426_s28  ;;  %2274 = vmatprep.mubr.msk.f32.mxu0 %vm1013_vm9, %v987_v61  ;;  %v971_v10 = vsel %vm967_vm7, %v954_v59, %v760_v60  ;;  %v2158_v60 = vld [vmem:[%s2496_s25 + $0xc9] sm:$0xff]  ;;  %v2143_v59 = vld [vmem:[%s2496_s25 + $0xd8] sm:$0xff] }
  0xd5   : > { %459 = vrot.lane.b32.xlu0 %v2170_v42, %s2424_s26  ;;  %2308 = vmatprep.mubr.msk.f32.mxu1 %vm1013_vm9, %v987_v61 }
  0xd6   : > { %v572_v4 = vpop.permute.xlu1 %571 }
  0xd7   : > { %v2795_v54 = vpop.permute.xlu0 %381  ;;  %v922_v38 = vsel %vm916_vm4, %v905_v52, %v572_v4 }
  0xd8   : > { %773 = vrot.lane.b32.xlu1 %v2155_v0, %s2430_s8 }
  0xd9   : > { %711 = vrot.lane.b32.xlu0 %v2791_v2, %s2429_s4 }
  0xda   : > { %v824_v11 = vpop.permute.xlu1 %823 }
  0xdb   : > { %v634_v6 = vpop.permute.xlu0 %633  ;;  %v988_v12 = vsel %vm984_vm8, %v971_v10, %v824_v11 }
  0xdc   : > { %585 = vrot.lane.b32.xlu1 %v2155_v0, %s2427_s29  ;;  %2275 = vmatmul.mubr.msk.f32.gmra.mxu0 %vm1013_vm9, %v988_v12  ;;  %v938_v9 = vsel %vm933_vm5, %v921_v39, %v634_v6  ;;  %v872_v6 = vsel %vm865_vm1, %v2587_v26, %v2795_v54  ;;  %v2176_v54 = vld [vmem:[%s2496_s25 + $0xe2] sm:$0xff] }
  0xdd   : > { %523 = vrot.lane.b32.xlu0 %v2791_v2, %s2426_s28  ;;  %2309 = vmatmul.mubr.msk.f32.gmra.mxu1 %vm1013_vm9, %v988_v12 }
  0xde   : > { %v2812_v15 = vpop.permute.xlu1 %445 }
  0xdf   : > { %v2814_v17 = vpop.permute.xlu0 %383  ;;  %v889_v12 = vsel %vm882_vm2, %v872_v6, %v2812_v15  ;;  %v2175_v15 = vld [vmem:[%s2496_s25 + $0xda] sm:$0xff] }
  0xe0   : > { %837 = vrot.lane.b32.xlu1 %v2171_v13, %s2431_s20  ;;  %v873_v33 = vsel %vm865_vm1, %v2597_v28, %v2814_v17 }
  0xe1   : > { %775 = vrot.lane.b32.xlu0 %v2156_v14, %s2430_s8 }
  0xe2   : > { %v698_v18 = vpop.permute.xlu1 %697 }
  0xe3   : > { %v636_v19 = vpop.permute.xlu0 %635  ;;  %v955_v23 = vsel %vm950_vm6, %v938_v9, %v698_v18 }
  0xe4   : > { %587 = vrot.lane.b32.xlu1 %v2156_v14, %s2427_s29  ;;  %v939_v57 = vsel %vm933_vm5, %v922_v38, %v636_v19 }
  0xe5   : > { %397 = vrot.lane.b32.xlu0 %v2155_v0, %s2425_s27 }
  0xe6   : > { %v2821_v22 = vpop.permute.xlu1 %509 }
  0xe7   : > { %v2823_v24 = vpop.permute.xlu0 %447  ;;  %v906_v18 = vsel %vm899_vm3, %v889_v12, %v2821_v22 }
  0xe8   : > { %839 = vrot.lane.b32.xlu1 %v2172_v21, %s2431_s20 }
  0xe9   : > { %649 = vrot.lane.b32.xlu0 %v2171_v13, %s2428_s30 }
  0xea   : > { %v762_v25 = vpop.permute.xlu1 %761 }
  0xeb   : > { %v700_v27 = vpop.permute.xlu0 %699  ;;  %v972_v37 = vsel %vm967_vm7, %v955_v23, %v762_v25 }
  0xec   : > { %461 = vrot.lane.b32.xlu1 %v2171_v13, %s2424_s26  ;;  %v956_v44 = vsel %vm950_vm6, %v939_v57, %v700_v27  ;;  %v2160_v13 = vld [vmem:[%s2496_s25 + $0xe1] sm:$0xff] }
  0xed   : > { %399 = vrot.lane.b32.xlu0 %v2156_v14, %s2425_s27  ;;  %v2159_v14 = vld [vmem:[%s2496_s25 + $0xd9] sm:$0xff]  ;;  %s2432_s27 = smov 112  }
  0xee   : > { %v2837_v35 = vpop.permute.xlu1 %573 }
  0xef   : > { %v2839_v36 = vpop.permute.xlu0 %511  ;;  %v923_v25 = vsel %vm916_vm4, %v906_v18, %v2837_v35  ;;  %v890_v35 = vsel %vm882_vm2, %v873_v33, %v2823_v24 }
  0xf0   : > { %713 = vrot.lane.b32.xlu1 %v2141_v31, %s2429_s4  ;;  %v907_v39 = vsel %vm899_vm3, %v890_v35, %v2839_v36 }
  0xf1   : > { %651 = vrot.lane.b32.xlu0 %v2172_v21, %s2428_s30 }
  0xf2   : > { %v826_v41 = vpop.permute.xlu1 %825 }
  0xf3   : > { %v764_v42 = vpop.permute.xlu0 %763  ;;  %v989_v43 = vsel %vm984_vm8, %v972_v37, %v826_v41 }
  0xf4   : > { %525 = vrot.lane.b32.xlu1 %v2141_v31, %s2426_s28  ;;  %2277 = vmatprep.mubr.msk.f32.mxu0 %vm1013_vm9, %v989_v43  ;;  %v973_v5 = vsel %vm967_vm7, %v956_v44, %v764_v42 }
  0xf5   : > { %463 = vrot.lane.b32.xlu0 %v2172_v21, %s2424_s26  ;;  %2311 = vmatprep.mubr.msk.f32.mxu1 %vm1013_vm9, %v989_v43 }
  0xf6   : > { %v2861_v55 = vpop.permute.xlu1 %575 }
  0xf7   : > { %v2863_v16 = vpop.permute.xlu0 %385  ;;  %v924_v37 = vsel %vm916_vm4, %v907_v39, %v2861_v55 }
  0xf8   : > { %777 = vrot.lane.b32.xlu1 %v2157_v49, %s2430_s8  ;;  %v874_v57 = vsel %vm865_vm1, %v2617_v32, %v2863_v16 }
  0xf9   : > { %715 = vrot.lane.b32.xlu0 %v2142_v50, %s2429_s4 }
  0xfa   : > { %v828_v47 = vpop.permute.xlu1 %827 }
  0xfb   : > { %v638_v56 = vpop.permute.xlu0 %637  ;;  %v990_v53 = vsel %vm984_vm8, %v973_v5, %v828_v47 }
  0xfc   : > { %589 = vrot.lane.b32.xlu1 %v2157_v49, %s2427_s29  ;;  %2278 = vmatmul.mubr.msk.f32.gmra.mxu0 %vm1013_vm9, %v990_v53  ;;  %v940_v27 = vsel %vm933_vm5, %v923_v25, %v638_v56 }
  0xfd   : > { %527 = vrot.lane.b32.xlu0 %v2142_v50, %s2426_s28  ;;  %2312 = vmatmul.mubr.msk.f32.gmra.mxu1 %vm1013_vm9, %v990_v53  ;;  %s2433_s28 = smov 48  }
  0xfe   : > { %v2878_v61 = vpop.permute.xlu1 %449 }
  0xff   : > { %v2880_v62 = vpop.permute.xlu0 %387  ;;  %v891_v44 = vsel %vm882_vm2, %v874_v57, %v2878_v61 }
 0x100   : > { %841 = vrot.lane.b32.xlu1 %v2173_v58, %s2431_s20  ;;  %v875_v32 = vsel %vm865_vm1, %v2627_v34, %v2880_v62 }
 0x101   : > { %779 = vrot.lane.b32.xlu0 %v2158_v60, %s2430_s8 }
 0x102   : > { %v702_v63 = vpop.permute.xlu1 %701 }
 0x103   : > { %v640_v0 = vpop.permute.xlu0 %639  ;;  %v957_v26 = vsel %vm950_vm6, %v940_v27, %v702_v63 }
 0x104   : > { %653 = vrot.lane.b32.xlu1 %v2173_v58, %s2428_s30  ;;  %v941_v28 = vsel %vm933_vm5, %v924_v37, %v640_v0 }
 0x105   : > { %591 = vrot.lane.b32.xlu0 %v2158_v60, %s2427_s29 }
 0x106   : > { %v514_v4 = vpop.permute.xlu1 %513 }
 0x107   : > { %v2887_v7 = vpop.permute.xlu0 %451  ;;  %v908_v5 = vsel %vm899_vm3, %v891_v44, %v514_v4 }
 0x108   : > { %655 = vrot.lane.b32.xlu1 %v2128_v3, %s2428_s30  ;;  %v892_v16 = vsel %vm882_vm2, %v875_v32, %v2887_v7  ;;  %s2435_s30 = smov 80  }
 0x109   : > { %843 = vrot.lane.b32.xlu0 %v2128_v3, %s2431_s20 }
 0x10a   : > { %v766_v10 = vpop.permute.xlu1 %765 }
 0x10b   : > { %v704_v11 = vpop.permute.xlu0 %703  ;;  %v974_v29 = vsel %vm967_vm7, %v957_v26, %v766_v10 }
 0x10c   : > { %719 = vrot.lane.b32.xlu1 %v2144_v8, %s2429_s4  ;;  %v958_v17 = vsel %vm950_vm6, %v941_v28, %v704_v11 }
 0x10d   : > { %717 = vrot.lane.b32.xlu0 %v2143_v59, %s2429_s4  ;;  %s2436_s4 = smov 96  }
 0x10e   : > { %v578_v19 = vpop.permute.xlu1 %577 }
 0x10f   : > { %v516_v21 = vpop.permute.xlu0 %515  ;;  %v925_v53 = vsel %vm916_vm4, %v908_v5, %v578_v19 }
 0x110   : > { %783 = vrot.lane.b32.xlu1 %v2160_v13, %s2430_s8  ;;  %v909_v61 = vsel %vm899_vm3, %v892_v16, %v516_v21 }
 0x111   : > { %781 = vrot.lane.b32.xlu0 %v2159_v14, %s2430_s8 }
 0x112   : > { %v830_v30 = vpop.permute.xlu1 %829 }
 0x113   : > { %v768_v31 = vpop.permute.xlu0 %767  ;;  %v991_v22 = vsel %vm984_vm8, %v974_v29, %v830_v30 }
 0x114   : > { %847 = vrot.lane.b32.xlu1 %v2176_v54, %s2431_s20  ;;  %2280 = vmatprep.mubr.msk.f32.mxu0 %vm1013_vm9, %v991_v22  ;;  %v975_v41 = vsel %vm967_vm7, %v958_v17, %v768_v31 }
 0x115   : > { %845 = vrot.lane.b32.xlu0 %v2175_v15, %s2431_s20  ;;  %2314 = vmatprep.mubr.msk.f32.mxu1 %vm1013_vm9, %v991_v22 }
 0x116   : > { %v580_v9 = vpop.permute.xlu1 %579 }
 0x117   : > { %v390_v23 = vpop.permute.xlu0 %389  ;;  %v926_v10 = vsel %vm916_vm4, %v909_v61, %v580_v9 }
 0x118   : > { %v876_v54 = vsel %vm865_vm1, %v2647_v40, %v390_v23 }
 0x11a   : > { %v832_v42 = vpop.permute.xlu1 %831 }
 0x11b   : > { %v642_v24 = vpop.permute.xlu0 %641  ;;  %v992_v43 = vsel %vm984_vm8, %v975_v41, %v832_v42 }
 0x11c   : > { %2281 = vmatmul.mubr.msk.f32.gmra.mxu0 %vm1013_vm9, %v992_v43  ;;  %2315 = vmatmul.mubr.msk.f32.gmra.mxu1 %vm1013_vm9, %v992_v43  ;;  %v942_v58 = vsel %vm933_vm5, %v925_v53, %v642_v24 }
 0x11e   : > { %v454_v36 = vpop.permute.xlu1 %453 }
 0x11f   : > { %v392_v45 = vpop.permute.xlu0 %391  ;;  %v893_v15 = vsel %vm882_vm2, %v876_v54, %v454_v36 }
 0x120   : > { %v877_v40 = vsel %vm865_vm1, %v2661_v46, %v392_v45 }
 0x122   : > { %v706_v48 = vpop.permute.xlu1 %705 }
 0x123   : > { %v644_v49 = vpop.permute.xlu0 %643  ;;  %v959_v60 = vsel %vm950_vm6, %v942_v58, %v706_v48 }
 0x124   : > { %v943_v11 = vsel %vm933_vm5, %v926_v10, %v644_v49 }
 0x126   : > { %v518_v50 = vpop.permute.xlu1 %517 }
 0x127   : > { %v456_v52 = vpop.permute.xlu0 %455  ;;  %v910_v29 = vsel %vm899_vm3, %v893_v15, %v518_v50 }
 0x128   : > { %v894_v23 = vsel %vm882_vm2, %v877_v40, %v456_v52 }
 0x12a   : > { %v770_v55 = vpop.permute.xlu1 %769 }
 0x12b   : > { %v708_v38 = vpop.permute.xlu0 %707  ;;  %v976_v63 = vsel %vm967_vm7, %v959_v60, %v770_v55 }
 0x12c   : > { %v960_v6 = vsel %vm950_vm6, %v943_v11, %v708_v38 }
 0x12e   : > { %v582_v47 = vpop.permute.xlu1 %581 }
 0x12f   : > { %v520_v56 = vpop.permute.xlu0 %519  ;;  %v927_v22 = vsel %vm916_vm4, %v910_v29, %v582_v47 }
 0x130   : > { %v911_v17 = vsel %vm899_vm3, %v894_v23, %v520_v56 }
 0x132   : > { %v834_v0 = vpop.permute.xlu1 %833 }
 0x133   : > { %v772_v3 = vpop.permute.xlu0 %771  ;;  %v993_v8 = vsel %vm984_vm8, %v976_v63, %v834_v0 }
 0x134   : > { %2283 = vmatprep.mubr.msk.f32.mxu0 %vm1013_vm9, %v993_v8  ;;  %2317 = vmatprep.mubr.msk.f32.mxu1 %vm1013_vm9, %v993_v8  ;;  %v977_v12 = vsel %vm967_vm7, %v960_v6, %v772_v3 }
 0x136   : > { %v584_v4 = vpop.permute.xlu1 %583 }
 0x137   : > { %v394_v59 = vpop.permute.xlu0 %393  ;;  %v928_v24 = vsel %vm916_vm4, %v911_v17, %v584_v4 }
 0x138   : > { %v878_v56 = vsel %vm865_vm1, %v2694_v1, %v394_v59 }
 0x13a   : > { %v836_v34 = vpop.permute.xlu1 %835 }
 0x13b   : > { %v646_v62 = vpop.permute.xlu0 %645  ;;  %v994_v13 = vsel %vm984_vm8, %v977_v12, %v836_v34 }
 0x13c   : > { %2284 = vmatmul.mubr.msk.f32.gmra.mxu0 %vm1013_vm9, %v994_v13  ;;  %2318 = vmatmul.mubr.msk.f32.gmra.mxu1 %vm1013_vm9, %v994_v13  ;;  %v944_v33 = vsel %vm933_vm5, %v927_v22, %v646_v62 }
 0x13e   : > { %v458_v7 = vpop.permute.xlu1 %457 }
 0x13f   : > { %v396_v14 = vpop.permute.xlu0 %395  ;;  %v895_v53 = vsel %vm882_vm2, %v878_v56, %v458_v7 }
 0x140   : > { %v879_v1 = vsel %vm865_vm1, %v2720_v20, %v396_v14 }
 0x142   : > { %v710_v18 = vpop.permute.xlu1 %709 }
 0x143   : > { %v648_v19 = vpop.permute.xlu0 %647  ;;  %v961_v35 = vsel %vm950_vm6, %v944_v33, %v710_v18 }
 0x144   : > { %v945_v43 = vsel %vm933_vm5, %v928_v24, %v648_v19 }
 0x146   : > { %v522_v21 = vpop.permute.xlu1 %521 }
 0x147   : > { %v460_v25 = vpop.permute.xlu0 %459  ;;  %v912_v58 = vsel %vm899_vm3, %v895_v53, %v522_v21 }
 0x148   : > { %v896_v59 = vsel %vm882_vm2, %v879_v1, %v460_v25 }
 0x14a   : > { %v774_v27 = vpop.permute.xlu1 %773 }
 0x14b   : > { %v712_v26 = vpop.permute.xlu0 %711  ;;  %v978_v39 = vsel %vm967_vm7, %v961_v35, %v774_v27 }
 0x14c   : > { %v962_v36 = vsel %vm950_vm6, %v945_v43, %v712_v26 }
 0x14e   : > { %v586_v30 = vpop.permute.xlu1 %585 }
 0x14f   : > { %v524_v31 = vpop.permute.xlu0 %523  ;;  %v929_v0 = vsel %vm916_vm4, %v912_v58, %v586_v30 }
 0x150   : > { %v913_v10 = vsel %vm899_vm3, %v896_v59, %v524_v31 }
 0x152   : > { %v838_v9 = vpop.permute.xlu1 %837 }
 0x153   : > { %v776_v37 = vpop.permute.xlu0 %775  ;;  %v995_v28 = vsel %vm984_vm8, %v978_v39, %v838_v9 }
 0x154   : > { %2286 = vmatprep.mubr.msk.f32.mxu0 %vm1013_vm9, %v995_v28  ;;  %2320 = vmatprep.mubr.msk.f32.mxu1 %vm1013_vm9, %v995_v28  ;;  %v979_v48 = vsel %vm967_vm7, %v962_v36, %v776_v37 }
 0x156   : > { %v588_v41 = vpop.permute.xlu1 %587 }
 0x157   : > { %v398_v42 = vpop.permute.xlu0 %397  ;;  %v930_v12 = vsel %vm916_vm4, %v913_v10, %v588_v41 }
 0x158   : > { %v880_v21 = vsel %vm865_vm1, %v2764_v51, %v398_v42 }
 0x15a   : > { %v840_v49 = vpop.permute.xlu1 %839 }
 0x15b   : > { %v650_v46 = vpop.permute.xlu0 %649  ;;  %v996_v45 = vsel %vm984_vm8, %v979_v48, %v840_v49  ;;  %v3028_v49 = vld [vmem:[%s3866_s2] ss:$0 sm:$0xff] }
 0x15c   : > { %2287 = vmatmul.mubr.msk.f32.gmra.mxu0 %vm1013_vm9, %v996_v45  ;;  %2321 = vmatmul.mubr.msk.f32.gmra.mxu1 %vm1013_vm9, %v996_v45  ;;  %v946_v3 = vsel %vm933_vm5, %v929_v0, %v650_v46 }
 0x15e   : > { %v462_v50 = vpop.permute.xlu1 %461 }
 0x15f   : > { %v400_v52 = vpop.permute.xlu0 %399  ;;  %v897_v27 = vsel %vm882_vm2, %v880_v21, %v462_v50 }
 0x160   : > { %v881_v25 = vsel %vm865_vm1, %v2791_v2, %v400_v52  ;;  %vm1504_vm1 = vcmask 392192  }
 0x162   : > { %v714_v55 = vpop.permute.xlu1 %713 }
 0x163   : > { %v652_v38 = vpop.permute.xlu0 %651  ;;  %v963_v8 = vsel %vm950_vm6, %v946_v3, %v714_v55 }
 0x164   : > { %v947_v34 = vsel %vm933_vm5, %v930_v12, %v652_v38 }
 0x166   : > { %v526_v57 = vpop.permute.xlu1 %525 }
 0x167   : > { %v464_v44 = vpop.permute.xlu0 %463  ;;  %v914_v54 = vsel %vm899_vm3, %v897_v27, %v526_v57 }
 0x168   : > { %v898_v26 = vsel %vm882_vm2, %v881_v25, %v464_v44  ;;  %vm1506_vm2 = vcmask 523264  }
 0x16a   : > { %v778_v5 = vpop.permute.xlu1 %777 }
 0x16b   : > { %v716_v47 = vpop.permute.xlu0 %715  ;;  %v980_v32 = vsel %vm967_vm7, %v963_v8, %v778_v5 }
 0x16c   : > { %v964_v62 = vsel %vm950_vm6, %v947_v34, %v716_v47 }
 0x16e   : > { %v590_v60 = vpop.permute.xlu1 %589 }
 0x16f   : > { %v528_v63 = vpop.permute.xlu0 %527  ;;  %v931_v31 = vsel %vm916_vm4, %v914_v54, %v590_v60 }
 0x170   : > { %v915_v15 = vsel %vm899_vm3, %v898_v26, %v528_v63  ;;  %vm1508_vm3 = vcmask 654336  }
 0x172   : > { %v842_v16 = vpop.permute.xlu1 %841 }
 0x173   : > { %v780_v61 = vpop.permute.xlu0 %779  ;;  %v997_v4 = vsel %vm984_vm8, %v980_v32, %v842_v16 }
 0x174   : > { %2289 = vmatprep.mubr.msk.f32.mxu0 %vm1013_vm9, %v997_v4  ;;  %2323 = vmatprep.mubr.msk.f32.mxu1 %vm1013_vm9, %v997_v4  ;;  %v981_v13 = vsel %vm967_vm7, %v964_v62, %v780_v61 }
 0x176   : > { %v654_v11 = vpop.permute.xlu1 %653 }
 0x177   : > { %v592_v6 = vpop.permute.xlu0 %591  ;;  %v948_v33 = vsel %vm933_vm5, %v931_v31, %v654_v11 }
 0x178   : > { %v932_v22 = vsel %vm916_vm4, %v915_v15, %v592_v6 }
 0x17a   : > { %v656_v7 = vpop.permute.xlu1 %655 }
 0x17b   : > { %v844_v20 = vpop.permute.xlu0 %843  ;;  %v949_v51 = vsel %vm933_vm5, %v932_v22, %v656_v7  ;;  %vm1510_vm5 = vcmask 785408  }
 0x17c   : > { %v998_v14 = vsel %vm984_vm8, %v981_v13, %v844_v20  ;;  %v2273_v17 = vpop.f32.mrf.mxu0 }
 0x17d   : > { %2290 = vmatmul.mubr.msk.f32.gmra.mxu0 %vm1013_vm9, %v998_v14  ;;  %2324 = vmatmul.mubr.msk.f32.gmra.mxu1 %vm1013_vm9, %v998_v14  ;;  %v2307_v41 = vpop.f32.mrf.mxu1  ;;  %v3043_v38 = vadd.f32 %v2273_v17, %v3028_v49 }
 0x17e   : > { %v720_v18 = vpop.permute.xlu1 %719  ;;  %v1132_v42 = vpop.f32.mrf.mxu0  ;;  %v3047_v44 = vadd.f32 %v2307_v41, %v3028_v49 }
 0x17f   : > { %v718_v19 = vpop.permute.xlu0 %717  ;;  %v966_v2 = vsel %vm950_vm6, %v949_v51, %v720_v18  ;;  %v1598_v24 = vpop.f32.mrf.mxu1  ;;  %v3050_v5 = vadd.f32 %v3028_v49, %v1132_v42 }
 0x180   : > { %v965_v35 = vsel %vm950_vm6, %v948_v33, %v718_v19  ;;  %v3055_v53 = vadd.f32 %v3028_v49, %v1598_v24  ;;  %vm1512_vm6 = vcmask 916480  }
 0x182   : > { %v784_v29 = vpop.permute.xlu1 %783 }
 0x183   : > { %v782_v30 = vpop.permute.xlu0 %781  ;;  %v983_v39 = vsel %vm967_vm7, %v966_v2, %v784_v29 }
 0x184   : > { %v982_v9 = vsel %vm967_vm7, %v965_v35, %v782_v30 }
 0x186   : > { %v848_v37 = vpop.permute.xlu1 %847 }
 0x187   : > { %v846_v28 = vpop.permute.xlu0 %845  ;;  %v1000_v40 = vsel %vm984_vm8, %v983_v39, %v848_v37 }
 0x188   : > { %v999_v23 = vsel %vm984_vm8, %v982_v9, %v846_v28 }
 0x189   : > { %2292 = vmatprep.mubr.msk.f32.mxu0 %vm1013_vm9, %v999_v23  ;;  %2326 = vmatprep.mubr.msk.f32.mxu1 %vm1013_vm9, %v999_v23 }
 0x18a   : > { %2293 = vmatmul.mubr.msk.f32.gmra.mxu0 %vm1013_vm9, %v1000_v40  ;;  %2327 = vmatmul.mubr.msk.f32.gmra.mxu1 %vm1013_vm9, %v1000_v40 }
 0x19c   : > { %v2276_v43 = vpop.f32.mrf.mxu0 }
 0x19d   : > { %v2310_v36 = vpop.f32.mrf.mxu1  ;;  %v3031_v45 = vadd.f32 %v2276_v43, %v3028_v49 }
 0x19e   : > { %v1142_v48 = vpop.f32.mrf.mxu0  ;;  %v3034_v50 = vadd.f32 %v2310_v36, %v3028_v49 }
 0x19f   : > { %v1608_v46 = vpop.f32.mrf.mxu1  ;;  %v3037_v52 = vadd.f32 %v3028_v49, %v1142_v48  ;;  %v1368_v57 = vrot.slane %v3031_v45, 7 }
 0x1a0   : > { %v3040_v55 = vadd.f32 %v3028_v49, %v1608_v46  ;;  %v1827_v56 = vrot.slane %v3034_v50, 7 }
 0x1a1   : > { %v1219_v47 = vrot.slane %v3037_v52, 7  ;;  %v1369_v58 = vsel %vm1220_vm10, %v1368_v57, %v3043_v38 }
 0x1a2   : > { %v1685_v60 = vrot.slane %v3040_v55, 7  ;;  %v1828_v0 = vsel %vm1220_vm10, %v1827_v56, %v3047_v44  ;;  %v1383_v56 = vrot.slane %v3043_v38, 1 }
 0x1a3   : > { %v1221_v63 = vsel %vm1220_vm10, %v1219_v47, %v3050_v5  ;;  %v1485_v47 = vrot.slane %v3043_v38, 7 }
 0x1a4   : > { %v1686_v3 = vsel %vm1220_vm10, %v1685_v60, %v3055_v53  ;;  %v1343_v60 = vrot.slane %v3050_v5, 7 }
 0x1bc   : > { %v2279_v8 = vpop.f32.mrf.mxu0 }
 0x1bd   : > { %v2313_v32 = vpop.f32.mrf.mxu1  ;;  %v3067_v4 = vadd.f32 %v2279_v8, %v3028_v49  ;;  %v1241_v8 = vrot.slane %v3050_v5, 1 }
 0x1be   : > { %v1152_v16 = vpop.f32.mrf.mxu0  ;;  %v3073_v59 = vadd.f32 %v2313_v32, %v3028_v49  ;;  %v1700_v32 = vrot.slane %v3055_v53, 1 }
 0x1bf   : > { %v1618_v61 = vpop.f32.mrf.mxu1  ;;  %v3070_v1 = vadd.f32 %v3028_v49, %v1152_v16  ;;  %v1370_v11 = vrot.slane %v3067_v4, 6  ;;  %v1258_v16 = vrot.slane %v3050_v5, 2 }
 0x1c0   : > { %v3076_v10 = vadd.f32 %v3028_v49, %v1618_v61  ;;  %v1829_v12 = vrot.slane %v3073_v59, 6  ;;  %v1717_v61 = vrot.slane %v3055_v53, 2 }
 0x1c1   : > { %v1222_v6 = vrot.slane %v3070_v1, 6  ;;  %v1371_v62 = vsel %vm1223_vm11, %v1370_v11, %v1369_v58  ;;  %v1842_v58 = vrot.slane %v3047_v44, 1  ;;  %v1275_v11 = vrot.slane %v3050_v5, 3 }
 0x1c2   : > { %3879 = vst [vmem:[#allocation2_spill] sm:$0xff] %v3076_v10  ;;  %v1687_v34 = vrot.slane %v3076_v10, 6  ;;  %v1830_v7 = vsel %vm1223_vm11, %v1829_v12, %v1828_v0  ;;  %v1859_v0 = vrot.slane %v3047_v44, 2  ;;  %v1734_v12 = vrot.slane %v3055_v53, 3 }
 0x1c3   : > { %v1224_v13 = vsel %vm1223_vm11, %v1222_v6, %v1221_v63  ;;  %v1400_v63 = vrot.slane %v3043_v38, 2  ;;  %v1876_v6 = vrot.slane %v3047_v44, 3 }
 0x1c4   : > { %v1688_v20 = vsel %vm1223_vm11, %v1687_v34, %v1686_v3  ;;  %v1417_v3 = vrot.slane %v3043_v38, 3  ;;  %v1434_v34 = vrot.slane %v3043_v38, 4 }
 0x1dc   : > { %v2282_v14 = vpop.f32.mrf.mxu0  ;;  %v2316_v18 = vpop.f32.mrf.mxu1 }
 0x1dd   : > { %v3087_v25 = vadd.f32 %v2282_v14, %v3028_v49  ;;  %v3093_v26 = vadd.f32 %v2316_v18, %v3028_v49  ;;  %v1486_v14 = vrot.slane %v3031_v45, 6  ;;  %v1309_v18 = vrot.slane %v3050_v5, 5 }
 0x1de   : > { %v1162_v19 = vpop.f32.mrf.mxu0  ;;  %v1628_v21 = vpop.f32.mrf.mxu1 }
 0x1df   : > { %v3090_v27 = vadd.f32 %v3028_v49, %v1162_v19  ;;  %v3096_v54 = vadd.f32 %v3028_v49, %v1628_v21  ;;  %v1372_v15 = vrot.slane %v3087_v25, 5  ;;  %v1831_v22 = vrot.slane %v3093_v26, 5 }
 0x1e0   : > { %v1910_v19 = vrot.slane %v3047_v44, 5  ;;  %v1768_v21 = vrot.slane %v3055_v53, 5 }
 0x1e1   : > { %3880 = vst [vmem:[#allocation3_spill] sm:$0xff] %v3096_v54  ;;  %v1225_v29 = vrot.slane %v3090_v27, 5  ;;  %v1373_v30 = vsel %vm1226_vm12, %v1372_v15, %v1371_v62  ;;  %v1689_v33 = vrot.slane %v3096_v54, 5  ;;  %v1832_v51 = vsel %vm1226_vm12, %v1831_v22, %v1830_v7 }
 0x1e2   : > { %v1292_v62 = vrot.slane %v3050_v5, 4  ;;  %v1751_v7 = vrot.slane %v3055_v53, 4  ;;  %v1468_v15 = vrot.slane %v3043_v38, 6  ;;  %v1344_v22 = vrot.slane %v3037_v52, 6 }
 0x1e3   : > { %v1227_v31 = vsel %vm1226_vm12, %v1225_v29, %v1224_v13  ;;  %v1690_v2 = vsel %vm1226_vm12, %v1689_v33, %v1688_v20  ;;  %v1893_v13 = vrot.slane %v3047_v44, 4  ;;  %v1451_v20 = vrot.slane %v3043_v38, 5 }
 0x1e4   : > { %v1326_v29 = vrot.slane %v3050_v5, 6  ;;  %v1401_v33 = vrot.slane %v3031_v45, 1  ;;  %v1259_v38 = vrot.slane %v3037_v52, 1  ;;  %v1418_v5 = vrot.slane %v3031_v45, 2 }
 0x1fc   : > { %v2285_v35 = vpop.f32.mrf.mxu0  ;;  %v2319_v39 = vpop.f32.mrf.mxu1 }
 0x1fd   : > { %v3107_v28 = vadd.f32 %v2285_v35, %v3028_v49  ;;  %v3110_v40 = vadd.f32 %v2319_v39, %v3028_v49  ;;  %v3167_v35 = vsel %vm1220_vm10, %v3031_v45, %v1383_v56  ;;  %v1802_v39 = vrot.slane %v3055_v53, 7 }
 0x1fe   : > { %v1172_v9 = vpop.f32.mrf.mxu0  ;;  %v1638_v37 = vpop.f32.mrf.mxu1  ;;  %v3190_v56 = vsel %vm1220_vm10, %v1344_v22, %v1343_v60 }
 0x1ff   : > { %3881 = vst [vmem:[#allocation4_spill] sm:$0xff] %v3107_v28  ;;  %3882 = vst [vmem:[#allocation5_spill] sm:$0xff] %v3110_v40  ;;  %v3113_v23 = vadd.f32 %v3028_v49, %v1172_v9  ;;  %v3116_v17 = vadd.f32 %v3028_v49, %v1638_v37  ;;  %v1374_v41 = vrot.slane %v3107_v28, 4  ;;  %v1833_v24 = vrot.slane %v3110_v40, 4 }
 0x200   : > { %v1487_v9 = vsel %vm1220_vm10, %v1486_v14, %v1485_v47  ;;  %v3175_v37 = vsel %vm1220_vm10, %v3034_v50, %v1842_v58  ;;  %v1402_v58 = vsel %vm1220_vm10, %v1401_v33, %v1400_v63  ;;  %v1894_v40 = vrot.slane %v3034_v50, 3 }
 0x201   : > { %3883 = vst [vmem:[#allocation6_spill] sm:$0xff] %v3113_v23  ;;  %3884 = vst [vmem:[#allocation7_spill] sm:$0xff] %v3116_v17  ;;  %v1228_v42 = vrot.slane %v3113_v23, 4  ;;  %v1691_v43 = vrot.slane %v3116_v17, 4  ;;  %v3123_v36 = vsel %vm1229_vm13, %v1374_v41, %v1373_v30  ;;  %v3129_v46 = vsel %vm1229_vm13, %v1833_v24, %v1832_v51 }
 0x202   : > { %v1927_v30 = vrot.slane %v3047_v44, 6  ;;  %v1860_v51 = vrot.slane %v3034_v50, 1  ;;  %v1718_v41 = vrot.slane %v3040_v55, 1  ;;  %v3185_v24 = vsel %vm1220_vm10, %v3040_v55, %v1700_v32 }
 0x203   : > { %v3126_v48 = vsel %vm1229_vm13, %v1228_v42, %v1227_v31  ;;  %v3132_v57 = vsel %vm1229_vm13, %v1691_v43, %v1690_v2  ;;  %v1785_v31 = vrot.slane %v3055_v53, 6  ;;  %v1944_v2 = vrot.slane %v3047_v44, 7 }
 0x204   : > { %v1276_v44 = vrot.slane %v3037_v52, 2  ;;  %v3181_v42 = vsel %vm1220_vm10, %v3037_v52, %v1241_v8  ;;  %v1877_v53 = vrot.slane %v3034_v50, 2  ;;  %v1735_v43 = vrot.slane %v3040_v55, 2 }
 0x205   : > { %v1861_v14 = vsel %vm1220_vm10, %v1860_v51, %v1859_v0  ;;  %v1435_v17 = vrot.slane %v3031_v45, 3  ;;  %v1260_v8 = vsel %vm1220_vm10, %v1259_v38, %v1258_v16  ;;  %v3197_v23 = vsel %vm1220_vm10, %v1418_v5, %v1417_v3 }
 0x206   : > { %v1293_v32 = vrot.slane %v3037_v52, 3  ;;  %v1719_v54 = vsel %vm1220_vm10, %v1718_v41, %v1717_v61  ;;  %v3203_v60 = vsel %vm1220_vm10, %v1276_v44, %v1275_v11  ;;  %v1752_v63 = vrot.slane %v3040_v55, 3 }
 0x207   : > { %v1452_v0 = vrot.slane %v3031_v45, 4  ;;  %v3208_v22 = vsel %vm1220_vm10, %v1877_v53, %v1876_v6  ;;  %v3211_v3 = vsel %vm1220_vm10, %v1735_v43, %v1734_v12  ;;  %v1310_v16 = vrot.slane %v3037_v52, 4 }
 0x208   : > { %v1911_v33 = vrot.slane %v3034_v50, 4  ;;  %v3216_v61 = vsel %vm1220_vm10, %v1435_v17, %v1434_v34  ;;  %v1769_v11 = vrot.slane %v3040_v55, 4  ;;  %v1469_v38 = vrot.slane %v3031_v45, 5 }
 0x209   : > { %v1327_v5 = vrot.slane %v3037_v52, 5  ;;  %v3222_v6 = vsel %vm1220_vm10, %v1293_v32, %v1292_v62  ;;  %v3225_v12 = vsel %vm1220_vm10, %v1894_v40, %v1893_v13  ;;  %v1928_v41 = vrot.slane %v3034_v50, 5 }
 0x20a   : > { %v1786_v44 = vrot.slane %v3040_v55, 5  ;;  %v3230_v17 = vsel %vm1220_vm10, %v1752_v63, %v1751_v7  ;;  %v3233_v34 = vsel %vm1220_vm10, %v1452_v0, %v1451_v20  ;;  %v1945_v45 = vrot.slane %v3034_v50, 6 }
 0x20b   : > { %v1803_v52 = vrot.slane %v3040_v55, 6  ;;  %v1311_v13 = vsel %vm1220_vm10, %v1310_v16, %v1309_v18  ;;  %v3245_v43 = vsel %vm1220_vm10, %v1911_v33, %v1910_v19  ;;  %v1488_v7 = vrot.slane %v3067_v4, 5 }
 0x20c   : > { %v1770_v20 = vsel %vm1220_vm10, %v1769_v11, %v1768_v21  ;;  %v1470_v32 = vsel %vm1220_vm10, %v1469_v38, %v1468_v15  ;;  %v3251_v50 = vsel %vm1220_vm10, %v1327_v5, %v1326_v29  ;;  %v1929_v18 = vsel %vm1220_vm10, %v1928_v41, %v1927_v30 }
 0x20d   : > { %v3261_v19 = vsel %vm1220_vm10, %v1786_v44, %v1785_v31  ;;  %v1385_v63 = vrot.slane %v3067_v4, 7  ;;  %v1844_v21 = vrot.slane %v3073_v59, 7  ;;  %v3266_v15 = vsel %vm1220_vm10, %v1945_v45, %v1944_v2 }
 0x20e   : > { %v3269_v29 = vsel %vm1220_vm10, %v1803_v52, %v1802_v39  ;;  %v3277_v30 = vsel %vm1223_vm11, %v3073_v59, %v1861_v14  ;;  %v1489_v16 = vsel %vm1223_vm11, %v1488_v7, %v1487_v9  ;;  %v1346_v2 = vrot.slane %v3070_v1, 5 }
 0x20f   : > { %3885 = vst [vmem:[#allocation8_spill] sm:$0xff] %v3269_v29  ;;  %v1243_v33 = vrot.slane %v3070_v1, 7  ;;  %v1420_v39 = vrot.slane %v3067_v4, 1  ;;  %v1386_v9 = vsel %vm1223_vm11, %v1385_v63, %v3167_v35  ;;  %v1845_v38 = vsel %vm1223_vm11, %v1844_v21, %v3175_v37 }
 0x210   : > { %v1702_v5 = vrot.slane %v3076_v10, 7  ;;  %v1278_v41 = vrot.slane %v3070_v1, 1  ;;  %v1347_v37 = vsel %vm1223_vm11, %v1346_v2, %v3190_v56  ;;  %v1295_v52 = vrot.slane %v3070_v1, 2 }
 0x211   : > { %v1421_v45 = vsel %vm1223_vm11, %v1420_v39, %v3197_v23  ;;  %v1754_v56 = vrot.slane %v3076_v10, 2  ;;  %v1312_v63 = vrot.slane %v3070_v1, 3  ;;  %v1913_v23 = vrot.slane %v3073_v59, 3 }
 0x212   : > { %v1703_v7 = vsel %vm1223_vm11, %v1702_v5, %v3185_v24  ;;  %v1279_v21 = vsel %vm1223_vm11, %v1278_v41, %v3203_v60  ;;  %v1930_v39 = vrot.slane %v3073_v59, 4  ;;  %v1296_v60 = vsel %vm1223_vm11, %v1295_v52, %v3222_v6 }
 0x213   : > { %v1947_v5 = vrot.slane %v3073_v59, 5  ;;  %v3362_v6 = vsel %vm1223_vm11, %v1913_v23, %v3245_v43  ;;  %v1348_v43 = vrot.slane %v3090_v27, 4  ;;  %v1262_v52 = vrot.slane %v3090_v27, 7 }
 0x21c   : > { %v2288_v47 = vpop.f32.mrf.mxu0  ;;  %v2322_v28 = vpop.f32.mrf.mxu1 }
 0x21d   : > { %v3238_v62 = vadd.f32 %v2288_v47, %v3028_v49  ;;  %v3254_v55 = vadd.f32 %v2322_v28, %v3028_v49  ;;  %v3273_v28 = vsel %vm1223_vm11, %v3067_v4, %v1402_v58 }
 0x21e   : > { %v1182_v51 = vpop.f32.mrf.mxu0  ;;  %v1648_v53 = vpop.f32.mrf.mxu1 }
 0x21f   : > { %v3241_v40 = vadd.f32 %v3028_v49, %v1182_v51  ;;  %v3257_v47 = vadd.f32 %v3028_v49, %v1648_v53  ;;  %v1376_v31 = vrot.slane %v3238_v62, 3  ;;  %v1835_v51 = vrot.slane %v3254_v55, 3 }
 0x220   : > { %v1879_v53 = vrot.slane %v3073_v59, 1 }
 0x221   : > { %v1231_v0 = vrot.slane %v3241_v40, 3  ;;  %v3287_v58 = vsel %vm1232_vm14, %v1376_v31, %v3123_v36  ;;  %v1693_v11 = vrot.slane %v3257_v47, 3  ;;  %v3302_v36 = vsel %vm1223_vm11, %v3070_v1, %v1260_v8 }
 0x222   : > { %v3311_v44 = vsel %vm1232_vm14, %v1835_v51, %v3129_v46  ;;  %v1244_v8 = vsel %vm1223_vm11, %v1243_v33, %v3181_v42  ;;  %v1437_v46 = vrot.slane %v3067_v4, 2  ;;  %v1454_v42 = vrot.slane %v3067_v4, 3 }
 0x223   : > { %v3291_v14 = vsel %vm1232_vm14, %v1231_v0, %v3126_v48  ;;  %v3306_v48 = vsel %vm1223_vm11, %v3076_v10, %v1719_v54  ;;  %v3315_v35 = vsel %vm1232_vm14, %v1693_v11, %v3132_v57  ;;  %v1737_v54 = vrot.slane %v3076_v10, 1 }
 0x224   : > { %v1896_v57 = vrot.slane %v3073_v59, 2  ;;  %v1771_v31 = vrot.slane %v3076_v10, 3  ;;  %v1471_v0 = vrot.slane %v3067_v4, 4  ;;  %v1880_v2 = vsel %vm1223_vm11, %v1879_v53, %v3208_v22 }
 0x225   : > { %v1738_v24 = vsel %vm1223_vm11, %v1737_v54, %v3211_v3  ;;  %v1329_v33 = vrot.slane %v3070_v1, 4  ;;  %v1438_v51 = vsel %vm1223_vm11, %v1437_v46, %v3216_v61  ;;  %v1788_v4 = vrot.slane %v3076_v10, 4  ;;  %v3889_v54 = vld [vmem:[#allocation3_spill] sm:$0xff] }
 0x226   : > { %v1897_v11 = vsel %vm1223_vm11, %v1896_v57, %v3225_v12  ;;  %v1755_v22 = vsel %vm1223_vm11, %v1754_v56, %v3230_v17  ;;  %v1455_v3 = vsel %vm1223_vm11, %v1454_v42, %v3233_v34  ;;  %v3356_v1 = vsel %vm1223_vm11, %v1312_v63, %v1311_v13 }
 0x227   : > { %v1490_v61 = vrot.slane %v3087_v25, 4  ;;  %v3365_v12 = vsel %vm1223_vm11, %v1771_v31, %v1770_v20  ;;  %v3368_v41 = vsel %vm1223_vm11, %v1471_v0, %v1470_v32  ;;  %v1387_v17 = vrot.slane %v3087_v25, 6 }
 0x228   : > { %v1846_v34 = vrot.slane %v3093_v26, 6  ;;  %v3374_v13 = vsel %vm1223_vm11, %v1329_v33, %v3251_v50  ;;  %v3377_v59 = vsel %vm1223_vm11, %v1930_v39, %v1929_v18  ;;  %v1245_v53 = vrot.slane %v3090_v27, 6 }
 0x229   : > { %3886 = vst [vmem:[#allocation9_spill] sm:$0xff] %v3374_v13  ;;  %3887 = vst [vmem:[#allocation10_spill] sm:$0xff] %v3377_v59  ;;  %v1404_v20 = vrot.slane %v3087_v25, 7  ;;  %v3384_v32 = vsel %vm1223_vm11, %v1788_v4, %v3261_v19  ;;  %v1704_v46 = vrot.slane %v3889_v54, 6  ;;  %v1863_v50 = vrot.slane %v3093_v26, 7 }
 0x22a   : > { %3888 = vst [vmem:[#allocation11_spill] sm:$0xff] %v3384_v32  ;;  %v3391_v18 = vsel %vm1223_vm11, %v1947_v5, %v3266_v15  ;;  %v1491_v57 = vsel %vm1226_vm12, %v1490_v61, %v1489_v16  ;;  %v1721_v56 = vrot.slane %v3889_v54, 7  ;;  %v1422_v42 = vsel %vm1226_vm12, %v3087_v25, %v1421_v45 }
 0x22b   : > { %3890 = vst [vmem:[#allocation3_spill] sm:$0xff] %v3391_v18  ;;  %v1388_v63 = vsel %vm1226_vm12, %v1387_v17, %v1386_v9  ;;  %v1847_v23 = vsel %vm1226_vm12, %v1846_v34, %v1845_v38  ;;  %v1439_v31 = vrot.slane %v3087_v25, 1  ;;  %v1297_v0 = vrot.slane %v3090_v27, 1 }
 0x22c   : > { %v1349_v15 = vsel %vm1226_vm12, %v1348_v43, %v1347_v37  ;;  %v1246_v33 = vsel %vm1226_vm12, %v1245_v53, %v1244_v8  ;;  %v1405_v16 = vsel %vm1226_vm12, %v1404_v20, %v3273_v28  ;;  %v1898_v39 = vrot.slane %v3093_v26, 1  ;;  %v3892_v53 = vld [vmem:[#allocation5_spill] sm:$0xff] }
 0x22d   : > { %v1705_v4 = vsel %vm1226_vm12, %v1704_v46, %v1703_v7  ;;  %v1263_v9 = vsel %vm1226_vm12, %v1262_v52, %v3302_v36  ;;  %v1864_v38 = vsel %vm1226_vm12, %v1863_v50, %v3277_v30  ;;  %v1756_v5 = vrot.slane %v3889_v54, 1  ;;  %v3893_v50 = vld [vmem:[#allocation6_spill] sm:$0xff] }
 0x22e   : > { %v1722_v37 = vsel %vm1226_vm12, %v1721_v56, %v3306_v48  ;;  %v3417_v8 = vsel %vm1226_vm12, %v3090_v27, %v1279_v21  ;;  %v3421_v28 = vsel %vm1226_vm12, %v3093_v26, %v1880_v2  ;;  %v1456_v7 = vrot.slane %v3087_v25, 2  ;;  %v3891_v21 = vld [vmem:[#allocation4_spill] sm:$0xff] }
 0x22f   : > { %v3426_v36 = vsel %vm1226_vm12, %v3889_v54, %v1738_v24  ;;  %v3429_v30 = vsel %vm1226_vm12, %v1439_v31, %v1438_v51  ;;  %v3432_v61 = vsel %vm1226_vm12, %v1297_v0, %v1296_v60  ;;  %v1314_v48 = vrot.slane %v3090_v27, 2 }
 0x230   : > { %v1492_v17 = vrot.slane %v3891_v21, 3  ;;  %v3437_v2 = vsel %vm1226_vm12, %v1898_v39, %v1897_v11  ;;  %v1389_v51 = vrot.slane %v3891_v21, 5  ;;  %v1848_v20 = vrot.slane %v3892_v53, 5  ;;  %v3894_v39 = vld [vmem:[#allocation7_spill] sm:$0xff] }
 0x231   : > { %v1406_v60 = vrot.slane %v3891_v21, 6  ;;  %v3445_v46 = vsel %vm1226_vm12, %v1756_v5, %v1755_v22  ;;  %v1350_v56 = vrot.slane %v3893_v50, 3  ;;  %v1247_v31 = vrot.slane %v3893_v50, 5 }
 0x232   : > { %v3453_v0 = vsel %vm1226_vm12, %v1456_v7, %v1455_v3  ;;  %v1706_v19 = vrot.slane %v3894_v39, 5  ;;  %v1264_v43 = vrot.slane %v3893_v50, 6  ;;  %v1865_v34 = vrot.slane %v3892_v53, 6 }
 0x233   : > { %v1423_v22 = vrot.slane %v3891_v21, 7  ;;  %v1723_v10 = vrot.slane %v3894_v39, 6  ;;  %v3466_v29 = vsel %vm1226_vm12, %v1314_v48, %v3356_v1  ;;  %v1494_v3 = vrot.slane %v3238_v62, 2 }
 0x234   : > { %v1390_v7 = vsel %vm1229_vm13, %v1389_v51, %v1388_v63  ;;  %v1849_v18 = vsel %vm1229_vm13, %v1848_v20, %v1847_v23  ;;  %v3472_v32 = vsel %vm1229_vm13, %v1406_v60, %v1405_v16  ;;  %v1248_v13 = vsel %vm1229_vm13, %v1247_v31, %v1246_v33 }
 0x235   : > { %v1707_v1 = vsel %vm1229_vm13, %v1706_v19, %v1705_v4  ;;  %v3480_v48 = vsel %vm1229_vm13, %v1264_v43, %v1263_v9  ;;  %v3483_v63 = vsel %vm1229_vm13, %v1865_v34, %v1864_v38  ;;  %v3486_v23 = vsel %vm1229_vm13, %v1423_v22, %v1422_v42 }
 0x236   : > { %v1281_v33 = vrot.slane %v3893_v50, 7  ;;  %v1882_v19 = vrot.slane %v3892_v53, 7  ;;  %v1391_v38 = vrot.slane %v3238_v62, 4  ;;  %v1249_v42 = vrot.slane %v3241_v40, 4 }
 0x23d   : > { %v2291_v45 = vpop.f32.mrf.mxu0  ;;  %v2325_v11 = vpop.f32.mrf.mxu1 }
 0x23e   : > { %v3448_v52 = vadd.f32 %v2291_v45, %v3028_v49  ;;  %v1493_v45 = vsel %vm1229_vm13, %v1492_v17, %v1491_v57  ;;  %v1351_v57 = vsel %vm1229_vm13, %v1350_v56, %v1349_v15  ;;  %v1352_v17 = vrot.slane %v3241_v40, 2 }
 0x23f   : > { %v1192_v24 = vpop.f32.mrf.mxu0  ;;  %v1658_v59 = vpop.f32.mrf.mxu1  ;;  %v3490_v15 = vsel %vm1229_vm13, %v1723_v10, %v1722_v37  ;;  %v1495_v9 = vsel %vm1232_vm14, %v1494_v3, %v1493_v45  ;;  %v3501_v34 = vadd.f32 %v2325_v11, %v3028_v49 }
 0x240   : > { %v3460_v5 = vadd.f32 %v3028_v49, %v1192_v24  ;;  %v1496_v24 = vrot.slane %v3448_v52, 1  ;;  %v1353_v37 = vsel %vm1232_vm14, %v1352_v17, %v1351_v57  ;;  %v1393_v56 = vrot.slane %v3448_v52, 3 }
 0x241   : > { %v3516_v3 = vadd.f32 %v3028_v49, %v1658_v59  ;;  %v1850_v17 = vrot.slane %v3254_v55, 4 }
 0x242   : > { %v1354_v20 = vrot.slane %v3460_v5, 1  ;;  %v1497_v10 = vsel %vm1235_vm0, %v1496_v24, %v1495_v9  ;;  %v1251_v57 = vrot.slane %v3460_v5, 3  ;;  %v1392_v9 = vsel %vm1232_vm14, %v1391_v38, %v1390_v7 }
 0x243   : > { %v3539_v7 = vsel %vm1229_vm13, %v1281_v33, %v3417_v8 }
 0x244   : > { %v1355_v24 = vsel %vm1235_vm0, %v1354_v20, %v1353_v37  ;;  %v1852_v20 = vrot.slane %v3501_v34, 3  ;;  %v1740_v37 = vrot.slane %v3894_v39, 7 }
 0x24a   : > { %v2294_v16 = vpop.f32.mrf.mxu0  ;;  %v2328_v51 = vpop.f32.mrf.mxu1 }
 0x24b   : > { %v3495_v4 = vadd.f32 %v2294_v16, %v3028_v49  ;;  %v3507_v31 = vadd.f32 %v2328_v51, %v3028_v49 }
 0x24c   : > { %v1202_v43 = vpop.f32.mrf.mxu0  ;;  %v1668_v60 = vpop.f32.mrf.mxu1 }
 0x24d   : > { %v3510_v22 = vadd.f32 %v3028_v49, %v1202_v43  ;;  %v1498_v45 = vsel %vm1238_vm15, %v3495_v4, %v1497_v10  ;;  %v1395_v11 = vrot.slane %v3495_v4, 2  ;;  %v3523_v16 = vadd.f32 %v3028_v49, %v1668_v60 }
 0x24e   : > { %1499 = vrot.lane.b32.xlu1 %v1498_v45, %s2432_s27  ;;  %v1394_v43 = vsel %vm1235_vm0, %v1393_v56, %v1392_v9  ;;  %v1708_v10 = vrot.slane %v3257_v47, 4  ;;  %v1250_v60 = vsel %vm1232_vm14, %v1249_v42, %v1248_v13  ;;  %v1854_v45 = vrot.slane %v3507_v31, 2 }
 0x24f   : > { %v1356_v51 = vsel %vm1238_vm15, %v3510_v22, %v1355_v24  ;;  %v1253_v59 = vrot.slane %v3510_v22, 2  ;;  %v1396_v49 = vsel %vm1238_vm15, %v1395_v11, %v1394_v43  ;;  %v1252_v38 = vsel %vm1235_vm0, %v1251_v57, %v1250_v60 }
 0x250   : > { %1357 = vrot.lane.b32.xlu0 %v1356_v51, %s2432_s27  ;;  %v1710_v56 = vrot.slane %v3516_v3, 3  ;;  %v1408_v24 = vrot.slane %v3238_v62, 5  ;;  %v1867_v51 = vrot.slane %v3254_v55, 5  ;;  %v1851_v13 = vsel %vm1232_vm14, %v1850_v17, %v1849_v18 }
 0x251   : > { %v1254_v11 = vsel %vm1238_vm15, %v1253_v59, %v1252_v38  ;;  %v1712_v42 = vrot.slane %v3523_v16, 2  ;;  %v1266_v9 = vrot.slane %v3241_v40, 5  ;;  %v1853_v8 = vsel %vm1235_vm0, %v1852_v20, %v1851_v13 }
 0x252   : > { %1397 = vrot.lane.b32.xlu1 %v1396_v49, %s2427_s29  ;;  %v1709_v33 = vsel %vm1232_vm14, %v1708_v10, %v1707_v1  ;;  %v1410_v57 = vrot.slane %v3448_v52, 4  ;;  %v1725_v43 = vrot.slane %v3257_v47, 5  ;;  %v1855_v49 = vsel %vm1238_vm15, %v1854_v45, %v1853_v8 }
 0x253   : > { %v1412_v59 = vrot.slane %v3495_v4, 3  ;;  %v1268_v18 = vrot.slane %v3460_v5, 4  ;;  %v1869_v17 = vrot.slane %v3501_v34, 4  ;;  %v1711_v60 = vsel %vm1235_vm0, %v1710_v56, %v1709_v33 }
 0x254   : > { %1255 = vrot.lane.b32.xlu0 %v1254_v11, %s2427_s29  ;;  %v1409_v20 = vsel %vm1232_vm14, %v1408_v24, %v3472_v32  ;;  %v1868_v1 = vsel %vm1232_vm14, %v1867_v51, %v3483_v63  ;;  %v1425_v10 = vrot.slane %v3238_v62, 6  ;;  %v1713_v45 = vsel %vm1238_vm15, %v1712_v42, %v1711_v60 }
 0x255   : > { %v1267_v38 = vsel %vm1232_vm14, %v1266_v9, %v3480_v48  ;;  %v1270_v11 = vrot.slane %v3510_v22, 3  ;;  %v1283_v13 = vrot.slane %v3241_v40, 6  ;;  %v1411_v56 = vsel %vm1235_vm0, %v1410_v57, %v1409_v20 }
 0x256   : > { %1856 = vrot.lane.b32.xlu1 %v1855_v49, %s2427_s29  ;;  %v1726_v32 = vsel %vm1232_vm14, %v1725_v43, %v3490_v15  ;;  %v1727_v63 = vrot.slane %v3516_v3, 4  ;;  %v1427_v24 = vrot.slane %v3448_v52, 5  ;;  %v1413_v51 = vsel %vm1238_vm15, %v1412_v59, %v1411_v56 }
 0x257   : > { %v1269_v42 = vsel %vm1235_vm0, %v1268_v18, %v1267_v38  ;;  %v1870_v48 = vsel %vm1235_vm0, %v1869_v17, %v1868_v1  ;;  %v1871_v9 = vrot.slane %v3507_v31, 3  ;;  %v1729_v8 = vrot.slane %v3523_v16, 3 }
 0x258   : > { %1714 = vrot.lane.b32.xlu0 %v1713_v45, %s2427_s29  ;;  %v1285_v33 = vrot.slane %v3460_v5, 5  ;;  %v1378_v15 = vrot.slane %v3448_v52, 2  ;;  %v1380_v57 = vrot.slane %v3495_v4, 1  ;;  %v1271_v43 = vsel %vm1238_vm15, %v1270_v11, %v1269_v42  ;;  %s2434_s29 = smov 64  }
 0x259   : > { %v1234_v49 = vrot.slane %v3460_v5, 2  ;;  %v1237_v59 = vrot.slane %v3510_v22, 1  ;;  %v1837_v18 = vrot.slane %v3501_v34, 2  ;;  %v1728_v17 = vsel %vm1235_vm0, %v1727_v63, %v1726_v32 }
 0x25a   : > { %1414 = vrot.lane.b32.xlu1 %v1413_v51, %s2431_s20  ;;  %v1429_v60 = vrot.slane %v3495_v4, 4  ;;  %v1379_v20 = vsel %vm1235_vm0, %v1378_v15, %v3287_v58  ;;  %v1839_v1 = vrot.slane %v3507_v31, 1  ;;  %v1872_v45 = vsel %vm1238_vm15, %v1871_v9, %v1870_v48 }
 0x25b   : > { %v3598_v38 = vsel %vm1238_vm15, %v1380_v57, %v1379_v20  ;;  %v1236_v11 = vsel %vm1235_vm0, %v1234_v49, %v3291_v14  ;;  %v1838_v56 = vsel %vm1235_vm0, %v1837_v18, %v3311_v44  ;;  %v1695_v63 = vrot.slane %v3516_v3, 2 }
 0x25c   : > { %1272 = vrot.lane.b32.xlu0 %v1271_v43, %s2431_s20  ;;  %v3606_v32 = vsel %vm1238_vm15, %v1237_v59, %v1236_v11  ;;  %v3609_v58 = vsel %vm1238_vm15, %v1839_v1, %v1838_v56  ;;  %v1697_v51 = vrot.slane %v3523_v16, 1  ;;  %v1730_v42 = vsel %vm1238_vm15, %v1729_v8, %v1728_v17 }
 0x25d   : > { %v1426_v14 = vsel %vm1232_vm14, %v1425_v10, %v3486_v23  ;;  %v1287_v48 = vrot.slane %v3510_v22, 4  ;;  %v1884_v44 = vrot.slane %v3254_v55, 6  ;;  %v1886_v15 = vrot.slane %v3501_v34, 5 }
 0x25e   : > { %1873 = vrot.lane.b32.xlu1 %v1872_v45, %s2431_s20  ;;  %v1428_v9 = vsel %vm1235_vm0, %v1427_v24, %v1426_v14  ;;  %v1742_v57 = vrot.slane %v3257_v47, 6  ;;  %v1696_v43 = vsel %vm1235_vm0, %v1695_v63, %v3315_v35  ;;  %v1284_v23 = vsel %vm1232_vm14, %v1283_v13, %v3539_v7 }
 0x25f   : > { %v1430_v8 = vsel %vm1238_vm15, %v1429_v60, %v1428_v9  ;;  %v1888_v10 = vrot.slane %v3507_v31, 4  ;;  %v3629_v49 = vsel %vm1238_vm15, %v1697_v51, %v1696_v43  ;;  %v1286_v24 = vsel %vm1235_vm0, %v1285_v33, %v1284_v23 }
 0x260   : > { %1731 = vrot.lane.b32.xlu0 %v1730_v42, %s2431_s20  ;;  %v1883_v59 = vsel %vm1229_vm13, %v1882_v19, %v3421_v28  ;;  %v1744_v35 = vrot.slane %v3516_v3, 5  ;;  %v3895_v18 = vrot.slane %v3093_v26, 2  ;;  %v1288_v13 = vsel %vm1238_vm15, %v1287_v48, %v1286_v24 }
 0x261   : > { %v1885_v17 = vsel %vm1232_vm14, %v1884_v44, %v1883_v59  ;;  %v1746_v60 = vrot.slane %v3523_v16, 4  ;;  %v1442_v33 = vrot.slane %v3238_v62, 7  ;;  %v1741_v28 = vsel %vm1229_vm13, %v1740_v37, %v3426_v36 }
 0x262   : > { %1431 = vrot.lane.b32.xlu1 %v1430_v8, %s2433_s28  ;;  %v3641_v7 = vsel %vm1226_vm12, %v3895_v18, %v3362_v6  ;;  %v1887_v20 = vsel %vm1235_vm0, %v1886_v15, %v1885_v17  ;;  %v1444_v19 = vrot.slane %v3448_v52, 6  ;;  %v3896_v6 = vrot.slane %v3889_v54, 2 }
 0x263   : > { %v1889_v45 = vsel %vm1238_vm15, %v1888_v10, %v1887_v20  ;;  %v1743_v11 = vsel %vm1232_vm14, %v1742_v57, %v1741_v28  ;;  %v1446_v56 = vrot.slane %v3495_v4, 5  ;;  %v1300_v63 = vrot.slane %v3241_v40, 7 }
 0x264   : > { %1289 = vrot.lane.b32.xlu0 %v1288_v13, %s2433_s28  ;;  %v3657_v1 = vsel %vm1226_vm12, %v3896_v6, %v3365_v12  ;;  %v1745_v51 = vsel %vm1235_vm0, %v1744_v35, %v1743_v11  ;;  %v1441_v36 = vsel %vm1229_vm13, %v3891_v21, %v3429_v30  ;;  %v1302_v37 = vrot.slane %v3460_v5, 6 }
 0x265   : > { %v1473_v12 = vrot.slane %v3087_v25, 3  ;;  %v1747_v42 = vsel %vm1238_vm15, %v1746_v60, %v1745_v51  ;;  %v1443_v14 = vsel %vm1232_vm14, %v1442_v33, %v1441_v36  ;;  %v1304_v48 = vrot.slane %v3510_v22, 5 }
 0x266   : > { %1890 = vrot.lane.b32.xlu1 %v1889_v45, %s2433_s28  ;;  %v1901_v44 = vrot.slane %v3254_v55, 7  ;;  %v1445_v9 = vsel %vm1235_vm0, %v1444_v19, %v1443_v14  ;;  %v1299_v15 = vsel %vm1229_vm13, %v3893_v50, %v3432_v61  ;;  %v1903_v30 = vrot.slane %v3501_v34, 6 }
 0x267   : > { %v1331_v57 = vrot.slane %v3090_v27, 3  ;;  %v1447_v43 = vsel %vm1238_vm15, %v1446_v56, %v1445_v9  ;;  %v1301_v8 = vsel %vm1232_vm14, %v1300_v63, %v1299_v15  ;;  %v1905_v23 = vrot.slane %v3507_v31, 5 }
 0x268   : > { %1748 = vrot.lane.b32.xlu0 %v1747_v42, %s2433_s28  ;;  %v1759_v10 = vrot.slane %v3257_v47, 7  ;;  %v1303_v24 = vsel %vm1235_vm0, %v1302_v37, %v1301_v8  ;;  %v1900_v61 = vsel %vm1229_vm13, %v3892_v53, %v3437_v2  ;;  %v1761_v59 = vrot.slane %v3516_v3, 6 }
 0x269   : > { %v1458_v35 = vrot.slane %v3891_v21, 1  ;;  %v1305_v18 = vsel %vm1238_vm15, %v1304_v48, %v1303_v24  ;;  %v1902_v13 = vsel %vm1232_vm14, %v1901_v44, %v1900_v61  ;;  %v1763_v17 = vrot.slane %v3523_v16, 5 }
 0x26a   : > { %1448 = vrot.lane.b32.xlu1 %v1447_v43, %s2434_s29  ;;  %v1932_v60 = vrot.slane %v3093_v26, 3  ;;  %v1904_v33 = vsel %vm1235_vm0, %v1903_v30, %v1902_v13  ;;  %v1758_v20 = vsel %vm1229_vm13, %v3894_v39, %v3445_v46  ;;  %v1461_v2 = vrot.slane %v3448_v52, 7 }
 0x26b   : > { %v1316_v28 = vrot.slane %v3893_v50, 1  ;;  %v1906_v19 = vsel %vm1238_vm15, %v1905_v23, %v1904_v33  ;;  %v1760_v6 = vsel %vm1232_vm14, %v1759_v10, %v1758_v20  ;;  %v1463_v45 = vrot.slane %v3495_v4, 6 }
 0x26c   : > { %1306 = vrot.lane.b32.xlu0 %v1305_v18, %s2434_s29  ;;  %v1790_v11 = vrot.slane %v3889_v54, 3  ;;  %v1762_v56 = vsel %vm1235_vm0, %v1761_v59, %v1760_v6  ;;  %v1459_v63 = vsel %vm1229_vm13, %v1458_v35, %v3453_v0  ;;  %v1319_v46 = vrot.slane %v3460_v5, 7 }
 0x26d   : > { %v1917_v51 = vrot.slane %v3892_v53, 1  ;;  %v1764_v36 = vsel %vm1238_vm15, %v1763_v17, %v1762_v56  ;;  %v1460_v37 = vsel %vm1232_vm14, %v3238_v62, %v1459_v63  ;;  %v1321_v42 = vrot.slane %v3510_v22, 6  ;;  %v3898_v56 = vld [vmem:[#allocation10_spill] sm:$0xff] }
 0x26e   : > { %1907 = vrot.lane.b32.xlu1 %v1906_v19, %s2434_s29  ;;  %v1949_v14 = vrot.slane %v3093_v26, 4  ;;  %v1462_v48 = vsel %vm1235_vm0, %v1461_v2, %v1460_v37  ;;  %v1317_v44 = vsel %vm1229_vm13, %v1316_v28, %v3466_v29  ;;  %v1920_v0 = vrot.slane %v3501_v34, 7  ;;  %v3897_v19 = vld [vmem:[#allocation9_spill] sm:$0xff]  ;;  %v3899_v37 = vld [vmem:[#allocation11_spill] sm:$0xff] }
 0x26f   : > { %v1775_v9 = vrot.slane %v3894_v39, 1  ;;  %v1464_v15 = vsel %vm1238_vm15, %v1463_v45, %v1462_v48  ;;  %v1318_v30 = vsel %vm1232_vm14, %v3241_v40, %v1317_v44  ;;  %v1922_v43 = vrot.slane %v3507_v31, 6 }
 0x270   : > { %1765 = vrot.lane.b32.xlu0 %v1764_v36, %s2434_s29  ;;  %v1807_v8 = vrot.slane %v3889_v54, 4  ;;  %v1320_v23 = vsel %vm1235_vm0, %v1319_v46, %v1318_v30  ;;  %v1918_v29 = vsel %vm1229_vm13, %v1917_v51, %v3641_v7  ;;  %v1778_v10 = vrot.slane %v3516_v3, 7 }
 0x271   : > { %v1475_v24 = vrot.slane %v3891_v21, 2  ;;  %v1322_v61 = vsel %vm1238_vm15, %v1321_v42, %v1320_v23  ;;  %v1919_v59 = vsel %vm1232_vm14, %v3254_v55, %v1918_v29  ;;  %v1780_v35 = vrot.slane %v3523_v16, 6  ;;  %v3900_v23 = vld [vmem:[#allocation3_spill] sm:$0xff] }
 0x272   : > { %1465 = vrot.lane.b32.xlu1 %v1464_v15, %s2435_s30  ;;  %v1477_v18 = vrot.slane %v3238_v62, 1  ;;  %v1921_v13 = vsel %vm1235_vm0, %v1920_v0, %v1919_v59  ;;  %v1776_v17 = vsel %vm1229_vm13, %v1775_v9, %v3657_v1  ;;  %v1474_v21 = vsel %vm1226_vm12, %v1473_v12, %v3368_v41 }
 0x273   : > { %v1333_v7 = vrot.slane %v3893_v50, 2  ;;  %v1923_v33 = vsel %vm1238_vm15, %v1922_v43, %v1921_v13  ;;  %v1777_v20 = vsel %vm1232_vm14, %v3257_v47, %v1776_v17  ;;  %v1480_v62 = vrot.slane %v3495_v4, 7 }
 0x274   : > { %1323 = vrot.lane.b32.xlu0 %v1322_v61, %s2435_s30  ;;  %v1335_v2 = vrot.slane %v3241_v40, 1  ;;  %v1779_v28 = vsel %vm1235_vm0, %v1778_v10, %v1777_v20  ;;  %v1476_v1 = vsel %vm1229_vm13, %v1475_v24, %v1474_v21  ;;  %v1332_v25 = vsel %vm1226_vm12, %v1331_v57, %v3897_v19  ;;  %v3902_v61 = vld [vmem:[#allocation2_spill] sm:$0xff] }
 0x275   : > { %v1934_v41 = vrot.slane %v3892_v53, 2  ;;  %v1781_v50 = vsel %vm1238_vm15, %v1780_v35, %v1779_v28  ;;  %v1478_v12 = vsel %vm1232_vm14, %v1477_v18, %v1476_v1  ;;  %v1338_v4 = vrot.slane %v3510_v22, 7 }
 0x276   : > { %1924 = vrot.lane.b32.xlu1 %v1923_v33, %s2435_s30  ;;  %v1936_v40 = vrot.slane %v3254_v55, 1  ;;  %v1479_v6 = vsel %vm1235_vm0, %v3448_v52, %v1478_v12  ;;  %v1334_v45 = vsel %vm1229_vm13, %v1333_v7, %v1332_v25  ;;  %v1933_v27 = vsel %vm1226_vm12, %v1932_v60, %v3898_v56 }
 0x277   : > { %v1792_v57 = vrot.slane %v3894_v39, 2  ;;  %v1481_v63 = vsel %vm1238_vm15, %v1480_v62, %v1479_v6  ;;  %v1336_v46 = vsel %vm1232_vm14, %v1335_v2, %v1334_v45  ;;  %v1939_v51 = vrot.slane %v3507_v31, 7 }
 0x278   : > { %1782 = vrot.lane.b32.xlu0 %v1781_v50, %s2435_s30  ;;  %v1794_v22 = vrot.slane %v3257_v47, 1  ;;  %v1337_v52 = vsel %vm1235_vm0, %v3460_v5, %v1336_v46  ;;  %v1935_v36 = vsel %vm1229_vm13, %v1934_v41, %v1933_v27  ;;  %v1791_v60 = vsel %vm1226_vm12, %v1790_v11, %v3899_v37 }
 0x279   : > { %v1951_v42 = vrot.slane %v3892_v53, 3  ;;  %v1339_v48 = vsel %vm1238_vm15, %v1338_v4, %v1337_v52  ;;  %v1937_v44 = vsel %vm1232_vm14, %v1936_v40, %v1935_v36  ;;  %v1797_v0 = vrot.slane %v3523_v16, 7 }
 0x27a   : > { %1482 = vrot.lane.b32.xlu1 %v1481_v63, %s2436_s4  ;;  %v1953_v9 = vrot.slane %v3254_v55, 2  ;;  %v1938_v15 = vsel %vm1235_vm0, %v3501_v34, %v1937_v44  ;;  %v1793_v5 = vsel %vm1229_vm13, %v1792_v57, %v1791_v60  ;;  %v1955_v30 = vrot.slane %v3501_v34, 1  ;;  %v3901_v34 = vld [vmem:[#allocation8_spill] sm:$0xff] }
 0x27b   : > { %v1809_v11 = vrot.slane %v3894_v39, 3  ;;  %v1940_v53 = vsel %vm1238_vm15, %v1939_v51, %v1938_v15  ;;  %v1795_v43 = vsel %vm1232_vm14, %v1794_v22, %v1793_v5  ;;  %v1950_v29 = vsel %vm1226_vm12, %v1949_v14, %v3900_v23 }
 0x27c   : > { %1340 = vrot.lane.b32.xlu0 %v1339_v48, %s2436_s4  ;;  %v1811_v55 = vrot.slane %v3257_v47, 2  ;;  %v1796_v10 = vsel %vm1235_vm0, %v3516_v3, %v1795_v43  ;;  %v1952_v24 = vsel %vm1229_vm13, %v1951_v42, %v1950_v29  ;;  %v3903_v39 = vrot.slane %v3902_v61, 5 }
 0x27d   : > { %v1813_v35 = vrot.slane %v3516_v3, 1  ;;  %v1798_v18 = vsel %vm1238_vm15, %v1797_v0, %v1796_v10  ;;  %v1954_v26 = vsel %vm1232_vm14, %v1953_v9, %v1952_v24 }
 0x27e   : > { %1941 = vrot.lane.b32.xlu1 %v1940_v53, %s2436_s4  ;;  %v1806_v59 = vsel %vm1223_vm11, %v3903_v39, %v3901_v34  ;;  %v1956_v14 = vsel %vm1235_vm0, %v1955_v30, %v1954_v26 }
 0x27f   : > { %v1808_v47 = vsel %vm1226_vm12, %v1807_v8, %v1806_v59  ;;  %v1957_v17 = vsel %vm1238_vm15, %v3507_v31, %v1956_v14 }
 0x280   : > { %1799 = vrot.lane.b32.xlu0 %v1798_v18, %s2436_s4  ;;  %v1810_v13 = vsel %vm1229_vm13, %v1809_v11, %v1808_v47 }
 0x281   : > { %v1812_v21 = vsel %vm1232_vm14, %v1811_v55, %v1810_v13 }
 0x282   : > { %1958 = vrot.lane.b32.xlu1 %v1957_v17, %s2432_s27  ;;  %v1814_v3 = vsel %vm1235_vm0, %v1813_v35, %v1812_v21 }
 0x283   : > { %v1815_v7 = vsel %vm1238_vm15, %v3523_v16, %v1814_v3 }
 0x284   : > { %1816 = vrot.lane.b32.xlu0 %v1815_v7, %s2432_s27 }
 0x2c0   : > { %v1500_v54 = vpop.permute.xlu1 %1499 }
 0x2c2   : > { %v1358_v8 = vpop.permute.xlu0 %1357 }
 0x2c4   : > { %v1398_v33 = vpop.permute.xlu1 %1397 }
 0x2c5   : > { %v1514_v27 = vsel %vm916_vm4, %v3598_v38, %v1398_v33 }
 0x2c6   : > { %v1256_v20 = vpop.permute.xlu0 %1255 }
 0x2c7   : > { %v1502_v46 = vsel %vm916_vm4, %v3606_v32, %v1256_v20 }
 0x2c8   : > { %v1857_v62 = vpop.permute.xlu1 %1856 }
 0x2c9   : > { %v1968_v9 = vsel %vm916_vm4, %v3609_v58, %v1857_v62 }
 0x2ca   : > { %v1715_v2 = vpop.permute.xlu0 %1714 }
 0x2cb   : > { %v1961_v53 = vsel %vm916_vm4, %v3629_v49, %v1715_v2 }
 0x2cc   : > { %v1415_v31 = vpop.permute.xlu1 %1414 }
 0x2cd   : > { %v1515_v63 = vsel %vm984_vm8, %v1514_v27, %v1415_v31 }
 0x2ce   : > { %v1273_v28 = vpop.permute.xlu0 %1272 }
 0x2cf   : > { %v1503_v52 = vsel %vm984_vm8, %v1502_v46, %v1273_v28 }
 0x2d0   : > { %v1874_v1 = vpop.permute.xlu1 %1873 }
 0x2d1   : > { %v1969_v5 = vsel %vm984_vm8, %v1968_v9, %v1874_v1 }
 0x2d2   : > { %v1732_v19 = vpop.permute.xlu0 %1731 }
 0x2d3   : > { %v1962_v23 = vsel %vm984_vm8, %v1961_v53, %v1732_v19 }
 0x2d4   : > { %v1432_v25 = vpop.permute.xlu1 %1431 }
 0x2d5   : > { %v1516_v51 = vsel %vm1504_vm1, %v1515_v63, %v1432_v25 }
 0x2d6   : > { %v1290_v41 = vpop.permute.xlu0 %1289 }
 0x2d7   : > { %v1505_v38 = vsel %vm1504_vm1, %v1503_v52, %v1290_v41 }
 0x2d8   : > { %v1891_v50 = vpop.permute.xlu1 %1890 }
 0x2d9   : > { %v1970_v43 = vsel %vm1504_vm1, %v1969_v5, %v1891_v50 }
 0x2da   : > { %v1749_v12 = vpop.permute.xlu0 %1748 }
 0x2db   : > { %v1963_v58 = vsel %vm1504_vm1, %v1962_v23, %v1749_v12 }
 0x2dc   : > { %v1449_v4 = vpop.permute.xlu1 %1448 }
 0x2dd   : > { %v1517_v36 = vsel %vm1506_vm2, %v1516_v51, %v1449_v4 }
 0x2de   : > { %v1307_v16 = vpop.permute.xlu0 %1306 }
 0x2df   : > { %v1507_v32 = vsel %vm1506_vm2, %v1505_v38, %v1307_v16 }
 0x2e0   : > { %v1908_v40 = vpop.permute.xlu1 %1907 }
 0x2e1   : > { %v1971_v29 = vsel %vm1506_vm2, %v1970_v43, %v1908_v40 }
 0x2e2   : > { %v1766_v6 = vpop.permute.xlu0 %1765 }
 0x2e3   : > { %v1964_v24 = vsel %vm1506_vm2, %v1963_v58, %v1766_v6 }
 0x2e4   : > { %v1466_v45 = vpop.permute.xlu1 %1465 }
 0x2e5   : > { %v1518_v37 = vsel %vm1508_vm3, %v1517_v36, %v1466_v45 }
 0x2e6   : > { %v1324_v56 = vpop.permute.xlu0 %1323 }
 0x2e7   : > { %v1509_v48 = vsel %vm1508_vm3, %v1507_v32, %v1324_v56 }
 0x2e8   : > { %v1925_v57 = vpop.permute.xlu1 %1924 }
 0x2e9   : > { %v1972_v10 = vsel %vm1508_vm3, %v1971_v29, %v1925_v57 }
 0x2ea   : > { %v1783_v22 = vpop.permute.xlu0 %1782 }
 0x2eb   : > { %v1965_v39 = vsel %vm1508_vm3, %v1964_v24, %v1783_v22 }
 0x2ec   : > { %v1483_v60 = vpop.permute.xlu1 %1482 }
 0x2ed   : > { %v1519_v42 = vsel %vm1510_vm5, %v1518_v37, %v1483_v60 }
 0x2ee   : > { %v1520_v44 = vsel %vm1512_vm6, %v1519_v42, %v1500_v54  ;;  %v1341_v0 = vpop.permute.xlu0 %1340 }
 0x2ef   : > { %1522 = vst [vmem:[%s206_s5 + $0x8] sm:$0xff] %v1520_v44  ;;  %v1511_v15 = vsel %vm1510_vm5, %v1509_v48, %v1341_v0 }
 0x2f0   : > { %v1513_v30 = vsel %vm1512_vm6, %v1511_v15, %v1358_v8  ;;  %v1942_v11 = vpop.permute.xlu1 %1941 }
 0x2f1   : > { %1521 = vst [vmem:[%s206_s5] sm:$0xff] %v1513_v30  ;;  %v1973_v34 = vsel %vm1510_vm5, %v1972_v10, %v1942_v11 }
 0x2f2   : > { %v1800_v55 = vpop.permute.xlu0 %1799 }
 0x2f3   : > { %v1966_v59 = vsel %vm1510_vm5, %v1965_v39, %v1800_v55 }
 0x2f4   : > { %v1959_v61 = vpop.permute.xlu1 %1958 }
 0x2f5   : > { %v1974_v49 = vsel %vm1512_vm6, %v1973_v34, %v1959_v61 }
 0x2f6   : > { %1976 = vst [vmem:[%s206_s5 + $0x18] sm:$0xff] %v1974_v49  ;;  %v1817_v35 = vpop.permute.xlu0 %1816 }
 0x2f7   : > { %v1967_v18 = vsel %vm1512_vm6, %v1966_v59, %v1817_v35 }
 0x2f8   : > { %1975 = vst [vmem:[%s206_s5 + $0x10] sm:$0xff] %v1967_v18 }
 0x2f9 PF: > { %s13_s16 = sadd.s32 1, %s2422_s16   ;;  %s3904_s12 = smov %s2414_s14 }
 0x2fa   : > { %p10_p7 = scmp.ge.s32.totalorder %s13_s16, 6   ;;  %s3905_s13 = smov %s2418_s15 }
 0x2fb   : > { %s3906_s14 = smov %s3909_s17  ;;  %s3907_s15 = smov %s3913_s18 }
 0x2fc   :  { %12 = sbr.rel (!%p10_p7) target bundleno = 3 (0x3), region = 65 }

</bundles_post_ra>
